<compile_context>
chip_gen: v7x
topology: tpu7x:2x2x1
jax: 0.10.0
libtpu: 0.0.40
codegen_flags: <defaults>
</compile_context>

<pallas_src>
import jax
import jax.numpy as jnp
from jax import lax
from jax.experimental import pallas as pl
from jax.experimental.pallas import tpu as pltpu


def _round_up(x, m):
    return ((x + m - 1) // m) * m


def _sigmoid(z):
    # Exact identity: sigmoid(z) = 0.5 * tanh(0.5 * z) + 0.5.
    # tanh is a single EUP push; the usual exp + reciprocal lowering is two.
    return 0.5 * jnp.tanh(0.5 * z) + 0.5


def _fusion_kernel(x_ref, graph_ref,
                   w_ih_ref, w_hh_ref, b_lstm_ref,
                   fc_w_ref, fc_b_ref,
                   gp_w_ref, gp_b_ref,
                   m1_w_ref, m1_b_ref,
                   m2_w_ref, m2_b_ref,
                   tw_ref, gw_ref,
                   out_ref,
                   gx_ref, h_ref, c_ref):
    Tc, TB, D = x_ref.shape
    H = w_hh_ref.shape[0]
    t_chunk = pl.program_id(1)
    mm_dtype = w_hh_ref.dtype      # f32, or bf16 when use_bf16_matmul=True

    # ---- Fresh LSTM state at the first time-chunk of every batch block.
    @pl.when(t_chunk == 0)
    def _():
        h_ref[...] = jnp.zeros_like(h_ref)
        c_ref[...] = jnp.zeros_like(c_ref)

    # ---- One-shot input projection for this chunk: a single (Tc*TB, D)x(D, 4H)
    #      MXU matmul with the (combined) bias folded in.
    x2 = x_ref[...].reshape(Tc * TB, D).astype(mm_dtype)
    gates_x = (jnp.dot(x2, w_ih_ref[...], preferred_element_type=jnp.float32)
               + b_lstm_ref[...])                        # (Tc*TB, 4H) f32
    gx_ref[...] = gates_x.reshape(Tc, TB, 4 * H)

    # ---- Sequential recurrence: only h @ W_hh remains per step.
    # TODO(synk): pltpu.matmul_push_rhs to keep W_hh staged across the loop is
    # only worthwhile if a bundle dump shows the MXU RHS push / vld on the
    # critical path; the recurrence is currently EUP-bound.
    def step(t, carry):
        h, c = carry
        gates = gx_ref[t] + jnp.dot(h.astype(mm_dtype), w_hh_ref[...],
                                    preferred_element_type=jnp.float32)
        i = _sigmoid(gates[:, 0:H])
        f = _sigmoid(gates[:, H:2 * H])
        g = jnp.tanh(gates[:, 2 * H:3 * H])
        o = _sigmoid(gates[:, 3 * H:4 * H])
        c_new = f * c + i * g
        h_new = o * jnp.tanh(c_new)
        return (h_new, c_new)

    unroll = Tc if Tc <= 8 else 8
    h_last, c_last = lax.fori_loop(0, Tc, step, (h_ref[...], c_ref[...]),
                                   unroll=unroll)
    h_ref[...] = h_last
    c_ref[...] = c_last

    # ---- Last chunk: branch projections + fused weighted heads + sigmoid.
    @pl.when(t_chunk == pl.num_programs(1) - 1)
    def _():
        text_emb = (jnp.dot(h_last, fc_w_ref[...],
                            preferred_element_type=jnp.float32) + fc_b_ref[...])
        graph_emb = (jnp.dot(graph_ref[...], gp_w_ref[...],
                             preferred_element_type=jnp.float32) + gp_b_ref[...])
        # Fold tw/gw into the (1, 512) head rows: one VPU multiply + one XLU
        # lane reduction instead of two N=1 MXU matmuls.
        w1 = tw_ref[...] * m1_w_ref[...]                               # (1, 512)
        w2 = gw_ref[...] * m2_w_ref[...]                               # (1, 512)
        fused_b = tw_ref[...] * m1_b_ref[...] + gw_ref[...] * m2_b_ref[...]
        pred = (jnp.sum(text_emb * w1 + graph_emb * w2, axis=-1, keepdims=True)
                + fused_b)                                             # (TB, 1)
        # TODO(synk): a lane-dense (1, TB) output block would avoid masked
        # (TB, 1) stores, but requires a sub-tile sublane->lane relayout; with
        # time-chunking this store runs once per batch block, so the robust
        # (TB, 1) block is kept.
        out_ref[...] = _sigmoid(pred)


def _default_batch_block(batch):
    """Batch block: split across both TensorCores on v7x; keep it large on
    single-core v5e/v6e (each grid step costs ~0.35 us and shrinks MXU rows)."""
    try:
        kind = jax.devices()[0].device_kind.lower()
    except Exception:
        kind = ""
    dual_core = ("v7" in kind) or ("tpu7" in kind)
    if batch <= 8:
        return batch
    if dual_core:
        if batch <= 256:
            return max(8, min(128, _round_up(pl.cdiv(batch, 2), 8)))
        return 128
    return batch if batch <= 128 else 128


def _pick_time_block(T, TB, H, D, budget_bytes=16 << 20):
    """Largest divisor of T whose gates scratch + double-buffered x block fit
    the budget (bounds VMEM independent of T; critical on v7x's 64 MiB VMEM)."""
    per_step = TB * 4 * (4 * H + 2 * D)          # f32 bytes per timestep
    tc = max(1, min(T, budget_bytes // max(per_step, 1)))
    while T % tc:
        tc -= 1
    return tc


def _vmem_limit_bytes(need):
    try:
        phys = int(pltpu.get_tpu_info().vmem_capacity_bytes)
    except Exception:
        phys = 64 * 1024 * 1024      # v7x per-core VMEM (smallest current gen)
    limit = max(int(need * 1.4) + (4 << 20), 32 << 20)
    limit = min(limit, int(phys * 0.9))
    return max(limit, int(need) + (2 << 20))


def transformer_modal_fusion(text_embedding, graph_embedding, labels, params, *,
                             batch_block=None, time_block=None,
                             use_bf16_matmul=False):
    """Forward pass of TransformerModalFusionModel (fusion_method='weighted').

    text_embedding: (B, T, D) float, graph_embedding: (B, G) float; labels unused.
    params["b_lstm"] MUST be the combined LSTM bias b_ih + b_hh.
    use_bf16_matmul: cast W_ih/W_hh (and x/h in-register) to bf16 for the MXU
    (native on v6e/v7x); gate math, state and accumulation stay f32.
    """
    del labels  # not used by the PyTorch forward
    B, T, D = text_embedding.shape
    G = graph_embedding.shape[1]
    H = params["w_hh"].shape[0]

    TB = int(batch_block) if batch_block is not None else _default_batch_block(B)
    nb = pl.cdiv(B, TB)
    B_pad = nb * TB

    x = text_embedding.astype(jnp.float32)
    g = graph_embedding.astype(jnp.float32)
    if B_pad != B:
        # Zero-pad ragged batch: rows are independent, padded rows stay finite
        # and are sliced off below.
        x = jnp.pad(x, ((0, B_pad - B), (0, 0), (0, 0)))
        g = jnp.pad(g, ((0, B_pad - B), (0, 0)))

    # TODO(synk): fold this transpose into the kernel (do the gates matmul in
    # (B, T, D) order + an in-VMEM relayout into the time-major scratch) to
    # remove one extra HBM pass over the text input.
    x_tbd = jnp.transpose(x, (1, 0, 2))                  # (T, B_pad, D)

    Tc = int(time_block) if time_block is not None else _pick_time_block(T, TB, H, D)
    assert T % Tc == 0, "time_block must divide T"
    n_tc = T // Tc

    w_dtype = jnp.bfloat16 if use_bf16_matmul else jnp.float32
    w_ih = params["w_ih"].astype(w_dtype)
    w_hh = params["w_hh"].astype(w_dtype)

    def full(shape):
        return pl.BlockSpec(shape, lambda i, t, _n=len(shape): (0,) * _n)

    in_specs = [
        pl.BlockSpec((Tc, TB, D), lambda i, t: (t, i, 0)),   # x (time-major)
        pl.BlockSpec((TB, G), lambda i, t: (i, 0)),          # graph
        full((D, 4 * H)),                                    # w_ih
        full((H, 4 * H)),                                    # w_hh
        full((1, 4 * H)),                                    # b_lstm (= b_ih + b_hh)
        full((H, 512)),                                      # fc_w
        full((1, 512)),                                      # fc_b
        full((G, 512)),                                      # gp_w
        full((1, 512)),                                      # gp_b
        full((1, 512)),                                      # m1_w (row vector)
        full((1, 1)),                                        # m1_b
        full((1, 512)),                                      # m2_w (row vector)
        full((1, 1)),                                        # m2_b
        full((1, 1)),                                        # tw
        full((1, 1)),                                        # gw
    ]
    out_specs = pl.BlockSpec((TB, 1), lambda i, t: (i, 0))

    wbytes = 2 if use_bf16_matmul else 4
    need = (Tc * TB * 4 * H * 4                  # gates scratch
            + 2 * TB * H * 4                     # h, c carry scratch
            + 2 * Tc * TB * D * 4                # x block (double-buffered)
            + 2 * TB * G * 4                     # graph block (double-buffered)
            + 2 * (D + H) * 4 * H * wbytes       # w_ih + w_hh
            + 2 * (H + G + 4) * 512 * 4          # fc_w, gp_w, biases, head rows
            + 2 * (4 * H + 32) * 4               # b_lstm + scalars
            + 2 * TB * 4)                        # out block

    flops = (2 * T * B_pad * D * 4 * H           # one-shot input projection
             + 2 * T * B_pad * H * 4 * H         # recurrent projection
             + 2 * B_pad * H * 512               # fc
             + 2 * B_pad * G * 512               # graph projection
             + 4 * B_pad * 512)                  # fused heads
    transcendentals = 5 * T * B_pad * H + B_pad  # tanh-form sigmoids + tanh
    bytes_accessed = (4 * (T * B_pad * D + B_pad * G + B_pad)
                      + wbytes * (D + H) * 4 * H
                      + 4 * (4 * H + (H + G + 4) * 512 + 16))

    out = pl.pallas_call(
        _fusion_kernel,
        out_shape=jax.ShapeDtypeStruct((B_pad, 1), jnp.float32),
        grid_spec=pltpu.PrefetchScalarGridSpec(
            num_scalar_prefetch=0,
            grid=(nb, n_tc),
            in_specs=in_specs,
            out_specs=out_specs,
            scratch_shapes=[
                pltpu.VMEM((Tc, TB, 4 * H), jnp.float32),    # gates (chunk)
                pltpu.VMEM((TB, H), jnp.float32),            # h carry
                pltpu.VMEM((TB, H), jnp.float32),            # c carry
            ]),
        compiler_params=pltpu.CompilerParams(
            dimension_semantics=("parallel", "arbitrary"),
            vmem_limit_bytes=_vmem_limit_bytes(need)),
        cost_estimate=pl.CostEstimate(
            flops=flops,
            transcendentals=transcendentals,
            bytes_accessed=bytes_accessed),
    )(x_tbd, g,
      w_ih, w_hh, params["b_lstm"],
      params["fc_w"], params["fc_b"],
      params["gp_w"], params["gp_b"],
      params["m1_w"], params["m1_b"],
      params["m2_w"], params["m2_b"],
      params["tw"], params["gw"])

    return out[:B]


def reference(text_embedding, graph_embedding, params):
    """Pure-JAX reference mirroring the PyTorch semantics."""
    B, T, D = text_embedding.shape
    H = params["w_hh"].shape[0]
    h = jnp.zeros((B, H), jnp.float32)
    c = jnp.zeros((B, H), jnp.float32)
    for t in range(T):
        gates = (text_embedding[:, t, :] @ params["w_ih"]
                 + h @ params["w_hh"] + params["b_lstm"])
        i = jax.nn.sigmoid(gates[:, :H])
        f = jax.nn.sigmoid(gates[:, H:2 * H])
        g = jnp.tanh(gates[:, 2 * H:3 * H])
        o = jax.nn.sigmoid(gates[:, 3 * H:])
        c = f * c + i * g
        h = o * jnp.tanh(c)
    text_emb = h @ params["fc_w"] + params["fc_b"]
    graph_emb = graph_embedding @ params["gp_w"] + params["gp_b"]
    tp = jnp.sum(text_emb * params["m1_w"], axis=-1, keepdims=True) + params["m1_b"]
    gp = jnp.sum(graph_emb * params["m2_w"], axis=-1, keepdims=True) + params["m2_b"]
    return jax.nn.sigmoid(params["tw"] * tp + params["gw"] * gp)


def init_params(key, text_dim, graph_dim, hidden_dim):
    ks = jax.random.split(key, 10)
    s = 0.1
    return {
        # LSTM weights stored transposed vs. PyTorch: (in, 4H) / (H, 4H);
        # b_lstm is the COMBINED bias b_ih + b_hh.
        "w_ih": s * jax.random.normal(ks[0], (text_dim, 4 * hidden_dim), jnp.float32),
        "w_hh": s * jax.random.normal(ks[1], (hidden_dim, 4 * hidden_dim), jnp.float32),
        "b_lstm": s * jax.random.normal(ks[2], (1, 4 * hidden_dim), jnp.float32),
        "fc_w": s * jax.random.normal(ks[3], (hidden_dim, 512), jnp.float32),
        "fc_b": s * jax.random.normal(ks[4], (1, 512), jnp.float32),
        "gp_w": s * jax.random.normal(ks[5], (graph_dim, 512), jnp.float32),
        "gp_b": s * jax.random.normal(ks[6], (1, 512), jnp.float32),
        # 512->1 heads stored as (1, 512) row vectors (PyTorch nn.Linear layout)
        "m1_w": s * jax.random.normal(ks[7], (1, 512), jnp.float32),
        "m1_b": jnp.zeros((1, 1), jnp.float32),
        "m2_w": s * jax.random.normal(ks[8], (1, 512), jnp.float32),
        "m2_b": jnp.zeros((1, 1), jnp.float32),
        "tw": jnp.full((1, 1), 0.8, jnp.float32),   # nn.Parameter(0.8)
        "gw": jnp.full((1, 1), 0.2, jnp.float32),   # nn.Parameter(0.2)
    }


if __name__ == "__main__":
    B, T = 2, 8
    TEXT_DIM, GRAPH_DIM, HIDDEN = 32, 32, 128

    key = jax.random.PRNGKey(0)
    k_text, k_graph, k_params, k_text2, k_graph2 = jax.random.split(key, 5)

    text_embedding = jax.random.normal(k_text, (B, T, TEXT_DIM), jnp.float32)
    graph_embedding = jax.random.normal(k_graph, (B, GRAPH_DIM), jnp.float32)
    labels = jnp.zeros((B, 1), jnp.float32)  # unused in forward
    params = init_params(k_params, TEXT_DIM, GRAPH_DIM, HIDDEN)

    ref = reference(text_embedding, graph_embedding, params)

    # f32 path, single time chunk.
    out = jax.block_until_ready(
        transformer_modal_fusion(text_embedding, graph_embedding, labels, params))
    assert out.shape == (B, 1), out.shape
    assert jnp.allclose(out, ref, atol=1e-3, rtol=1e-3), (out, ref)

    # f32 path with forced time-chunking (exercises the carried h/c scratch).
    out_chunked = jax.block_until_ready(
        transformer_modal_fusion(text_embedding, graph_embedding, labels, params,
                                 time_block=2))
    assert jnp.allclose(out_chunked, ref, atol=1e-3, rtol=1e-3), (out_chunked, ref)

    # bf16 MXU path (v6e/v7x): recurrence accumulates rounding -> looser tol.
    out_bf16 = jax.block_until_ready(
        transformer_modal_fusion(text_embedding, graph_embedding, labels, params,
                                 use_bf16_matmul=True))
    assert jnp.allclose(out_bf16, ref, atol=5e-2, rtol=5e-2), (out_bf16, ref)

    # Multi-batch-block path (nb = 2) with time-chunking.
    B2, T2 = 16, 6
    text2 = jax.random.normal(k_text2, (B2, T2, TEXT_DIM), jnp.float32)
    graph2 = jax.random.normal(k_graph2, (B2, GRAPH_DIM), jnp.float32)
    ref2 = reference(text2, graph2, params)
    out2 = jax.block_until_ready(
        transformer_modal_fusion(text2, graph2, jnp.zeros((B2, 1), jnp.float32),
                                 params, batch_block=8, time_block=3))
    assert out2.shape == (B2, 1), out2.shape
    assert jnp.allclose(out2, ref2, atol=1e-3, rtol=1e-3), (out2, ref2)

    print("KERNEL_OK")
</pallas_src>

<mosaic_0001>
module attributes {stable_mosaic.version = 11 : i64} {
  func.func @_fusion_kernel(%arg0: i32, %arg1: i32, %arg2: memref<8x2x32xf32, #tpu.memory_space<vmem>>, %arg3: memref<2x32xf32, #tpu.memory_space<vmem>>, %arg4: memref<32x512xf32, #tpu.memory_space<vmem>>, %arg5: memref<128x512xf32, #tpu.memory_space<vmem>>, %arg6: memref<1x512xf32, #tpu.memory_space<vmem>>, %arg7: memref<128x512xf32, #tpu.memory_space<vmem>>, %arg8: memref<1x512xf32, #tpu.memory_space<vmem>>, %arg9: memref<32x512xf32, #tpu.memory_space<vmem>>, %arg10: memref<1x512xf32, #tpu.memory_space<vmem>>, %arg11: memref<1x512xf32, #tpu.memory_space<vmem>>, %arg12: memref<1x1xf32, #tpu.memory_space<vmem>>, %arg13: memref<1x512xf32, #tpu.memory_space<vmem>>, %arg14: memref<1x1xf32, #tpu.memory_space<vmem>>, %arg15: memref<1x1xf32, #tpu.memory_space<vmem>>, %arg16: memref<1x1xf32, #tpu.memory_space<vmem>>, %arg17: memref<2x1xf32, #tpu.memory_space<vmem>>, %arg18: memref<8x2x512xf32, #tpu.memory_space<vmem>>, %arg19: memref<2x128xf32, #tpu.memory_space<vmem>>, %arg20: memref<2x128xf32, #tpu.memory_space<vmem>>) attributes {dimension_semantics = [#tpu.dimension_semantics<parallel>, #tpu.dimension_semantics<arbitrary>], iteration_bounds = array<i64: 1, 1>, scalar_prefetch = 0 : i64, scratch_operands = 3 : i64, tpu.core_type = #tpu.core_type<tc>, window_params = [{transform_indices = @transform_0, window_bounds = array<i64: 8, 2, 32>}, {transform_indices = @transform_1, window_bounds = array<i64: 2, 32>}, {pipeline_mode = #tpu.pipeline_mode<synchronous>, transform_indices = @transform_2, window_bounds = array<i64: 32, 512>}, {pipeline_mode = #tpu.pipeline_mode<synchronous>, transform_indices = @transform_3, window_bounds = array<i64: 128, 512>}, {pipeline_mode = #tpu.pipeline_mode<synchronous>, transform_indices = @transform_4, window_bounds = array<i64: 1, 512>}, {pipeline_mode = #tpu.pipeline_mode<synchronous>, transform_indices = @transform_5, window_bounds = array<i64: 128, 512>}, {pipeline_mode = #tpu.pipeline_mode<synchronous>, transform_indices = @transform_6, window_bounds = array<i64: 1, 512>}, {pipeline_mode = #tpu.pipeline_mode<synchronous>, transform_indices = @transform_7, window_bounds = array<i64: 32, 512>}, {pipeline_mode = #tpu.pipeline_mode<synchronous>, transform_indices = @transform_8, window_bounds = array<i64: 1, 512>}, {pipeline_mode = #tpu.pipeline_mode<synchronous>, transform_indices = @transform_9, window_bounds = array<i64: 1, 512>}, {pipeline_mode = #tpu.pipeline_mode<synchronous>, transform_indices = @transform_10, window_bounds = array<i64: 1, 1>}, {pipeline_mode = #tpu.pipeline_mode<synchronous>, transform_indices = @transform_11, window_bounds = array<i64: 1, 512>}, {pipeline_mode = #tpu.pipeline_mode<synchronous>, transform_indices = @transform_12, window_bounds = array<i64: 1, 1>}, {pipeline_mode = #tpu.pipeline_mode<synchronous>, transform_indices = @transform_13, window_bounds = array<i64: 1, 1>}, {pipeline_mode = #tpu.pipeline_mode<synchronous>, transform_indices = @transform_14, window_bounds = array<i64: 1, 1>}, {transform_indices = @transform_15, window_bounds = array<i64: 2, 1>}]} {
    %c0_i32 = arith.constant 0 : i32
    %0 = arith.cmpi eq, %arg1, %c0_i32 : i32
    %1 = arith.extui %0 : i1 to i32
    %c0_i32_0 = arith.constant 0 : i32
    %2 = arith.cmpi ne, %1, %c0_i32_0 : i32
    scf.if %2 {
      %cst_133 = arith.constant 0.000000e+00 : f32
      %315 = vector.broadcast %cst_133 : f32 to vector<2x128xf32>
      %c0_134 = arith.constant 0 : index
      %c0_135 = arith.constant 0 : index
      %316 = vector.load %arg19[%c0_134, %c0_135] : memref<2x128xf32, #tpu.memory_space<vmem>>, vector<2x128xf32>
      tpu.vector_store %arg19[%c0_134, %c0_135], %315 {strides = array<i32>} : memref<2x128xf32, #tpu.memory_space<vmem>>, vector<2x128xf32>,
      %cst_136 = arith.constant 0.000000e+00 : f32
      %317 = vector.broadcast %cst_136 : f32 to vector<2x128xf32>
      %c0_137 = arith.constant 0 : index
      %c0_138 = arith.constant 0 : index
      %318 = vector.load %arg20[%c0_137, %c0_138] : memref<2x128xf32, #tpu.memory_space<vmem>>, vector<2x128xf32>
      tpu.vector_store %arg20[%c0_137, %c0_138], %317 {strides = array<i32>} : memref<2x128xf32, #tpu.memory_space<vmem>>, vector<2x128xf32>,
    } else {
    }
    %c0 = arith.constant 0 : index
    %c0_1 = arith.constant 0 : index
    %c0_2 = arith.constant 0 : index
    %3 = vector.load %arg2[%c0, %c0_1, %c0_2] : memref<8x2x32xf32, #tpu.memory_space<vmem>>, vector<8x2x32xf32>
    %4 = vector.shape_cast %3 : vector<8x2x32xf32> to vector<16x32xf32>
    %c0_3 = arith.constant 0 : index
    %c0_4 = arith.constant 0 : index
    %5 = vector.load %arg4[%c0_3, %c0_4] : memref<32x512xf32, #tpu.memory_space<vmem>>, vector<32x512xf32>
    %cst = arith.constant dense<0.000000e+00> : vector<16x512xf32>
    %6 = tpu.matmul %4, %5, %cst {dimension_numbers = #tpu.dot_dimension_numbers<[1], [0], [0], [1], [0, 0, 1, 1], [], []>} : vector<16x32xf32>, vector<32x512xf32>, vector<16x512xf32> -> vector<16x512xf32>
    %c0_5 = arith.constant 0 : index
    %c0_6 = arith.constant 0 : index
    %7 = vector.load %arg6[%c0_5, %c0_6] : memref<1x512xf32, #tpu.memory_space<vmem>>, vector<1x512xf32>
    %8 = vector.broadcast %7 : vector<1x512xf32> to vector<16x512xf32>
    %9 = arith.addf %6, %8 : vector<16x512xf32>
    %10 = vector.shape_cast %9 : vector<16x512xf32> to vector<8x2x512xf32>
    %c0_7 = arith.constant 0 : index
    %c0_8 = arith.constant 0 : index
    %c0_9 = arith.constant 0 : index
    %11 = vector.load %arg18[%c0_7, %c0_8, %c0_9] : memref<8x2x512xf32, #tpu.memory_space<vmem>>, vector<8x2x512xf32>
    tpu.vector_store %arg18[%c0_7, %c0_8, %c0_9], %10 {strides = array<i32>} : memref<8x2x512xf32, #tpu.memory_space<vmem>>, vector<8x2x512xf32>,
    %c0_10 = arith.constant 0 : index
    %c0_11 = arith.constant 0 : index
    %12 = vector.load %arg19[%c0_10, %c0_11] : memref<2x128xf32, #tpu.memory_space<vmem>>, vector<2x128xf32>
    %c0_12 = arith.constant 0 : index
    %c0_13 = arith.constant 0 : index
    %13 = vector.load %arg20[%c0_12, %c0_13] : memref<2x128xf32, #tpu.memory_space<vmem>>, vector<2x128xf32>
    %c0_i32_14 = arith.constant 0 : i32
    %14 = arith.index_cast %c0_i32_14 : i32 to index
    %c0_15 = arith.constant 0 : index
    %c0_16 = arith.constant 0 : index
    %15 = vector.load %arg18[%14, %c0_15, %c0_16] : memref<8x2x512xf32, #tpu.memory_space<vmem>>, vector<1x2x512xf32>
    %16 = vector.shape_cast %15 : vector<1x2x512xf32> to vector<2x512xf32>
    %c0_17 = arith.constant 0 : index
    %c0_18 = arith.constant 0 : index
    %17 = vector.load %arg5[%c0_17, %c0_18] : memref<128x512xf32, #tpu.memory_space<vmem>>, vector<128x512xf32>
    %cst_19 = arith.constant dense<0.000000e+00> : vector<2x512xf32>
    %18 = tpu.matmul %12, %17, %cst_19 {dimension_numbers = #tpu.dot_dimension_numbers<[1], [0], [0], [1], [0, 0, 1, 1], [], []>} : vector<2x128xf32>, vector<128x512xf32>, vector<2x512xf32> -> vector<2x512xf32>
    %19 = arith.addf %16, %18 : vector<2x512xf32>
    %20 = vector.extract_strided_slice %19 {offsets = [0, 0], sizes = [2, 128], strides = [1, 1]} : vector<2x512xf32> to vector<2x128xf32>
    %cst_20 = arith.constant 5.000000e-01 : f32
    %21 = vector.broadcast %cst_20 : f32 to vector<2x128xf32>
    %22 = arith.mulf %21, %20 : vector<2x128xf32>
    %23 = math.tanh %22 : vector<2x128xf32>
    %cst_21 = arith.constant 5.000000e-01 : f32
    %24 = vector.broadcast %cst_21 : f32 to vector<2x128xf32>
    %25 = arith.mulf %24, %23 : vector<2x128xf32>
    %cst_22 = arith.constant 5.000000e-01 : f32
    %26 = vector.broadcast %cst_22 : f32 to vector<2x128xf32>
    %27 = arith.addf %25, %26 : vector<2x128xf32>
    %28 = vector.extract_strided_slice %19 {offsets = [0, 128], sizes = [2, 128], strides = [1, 1]} : vector<2x512xf32> to vector<2x128xf32>
    %cst_23 = arith.constant 5.000000e-01 : f32
    %29 = vector.broadcast %cst_23 : f32 to vector<2x128xf32>
    %30 = arith.mulf %29, %28 : vector<2x128xf32>
    %31 = math.tanh %30 : vector<2x128xf32>
    %cst_24 = arith.constant 5.000000e-01 : f32
    %32 = vector.broadcast %cst_24 : f32 to vector<2x128xf32>
    %33 = arith.mulf %32, %31 : vector<2x128xf32>
    %cst_25 = arith.constant 5.000000e-01 : f32
    %34 = vector.broadcast %cst_25 : f32 to vector<2x128xf32>
    %35 = arith.addf %33, %34 : vector<2x128xf32>
    %36 = vector.extract_strided_slice %19 {offsets = [0, 256], sizes = [2, 128], strides = [1, 1]} : vector<2x512xf32> to vector<2x128xf32>
    %37 = math.tanh %36 : vector<2x128xf32>
    %38 = vector.extract_strided_slice %19 {offsets = [0, 384], sizes = [2, 128], strides = [1, 1]} : vector<2x512xf32> to vector<2x128xf32>
    %cst_26 = arith.constant 5.000000e-01 : f32
    %39 = vector.broadcast %cst_26 : f32 to vector<2x128xf32>
    %40 = arith.mulf %39, %38 : vector<2x128xf32>
    %41 = math.tanh %40 : vector<2x128xf32>
    %cst_27 = arith.constant 5.000000e-01 : f32
    %42 = vector.broadcast %cst_27 : f32 to vector<2x128xf32>
    %43 = arith.mulf %42, %41 : vector<2x128xf32>
    %cst_28 = arith.constant 5.000000e-01 : f32
    %44 = vector.broadcast %cst_28 : f32 to vector<2x128xf32>
    %45 = arith.addf %43, %44 : vector<2x128xf32>
    %46 = arith.mulf %35, %13 : vector<2x128xf32>
    %47 = arith.mulf %27, %37 : vector<2x128xf32>
    %48 = arith.addf %46, %47 : vector<2x128xf32>
    %49 = math.tanh %48 : vector<2x128xf32>
    %50 = arith.mulf %45, %49 : vector<2x128xf32>
    %c1_i32 = arith.constant 1 : i32
    %51 = arith.index_cast %c1_i32 : i32 to index
    %c0_29 = arith.constant 0 : index
    %c0_30 = arith.constant 0 : index
    %52 = vector.load %arg18[%51, %c0_29, %c0_30] : memref<8x2x512xf32, #tpu.memory_space<vmem>>, vector<1x2x512xf32>
    %53 = vector.shape_cast %52 : vector<1x2x512xf32> to vector<2x512xf32>
    %c0_31 = arith.constant 0 : index
    %c0_32 = arith.constant 0 : index
    %54 = vector.load %arg5[%c0_31, %c0_32] : memref<128x512xf32, #tpu.memory_space<vmem>>, vector<128x512xf32>
    %cst_33 = arith.constant dense<0.000000e+00> : vector<2x512xf32>
    %55 = tpu.matmul %50, %54, %cst_33 {dimension_numbers = #tpu.dot_dimension_numbers<[1], [0], [0], [1], [0, 0, 1, 1], [], []>} : vector<2x128xf32>, vector<128x512xf32>, vector<2x512xf32> -> vector<2x512xf32>
    %56 = arith.addf %53, %55 : vector<2x512xf32>
    %57 = vector.extract_strided_slice %56 {offsets = [0, 0], sizes = [2, 128], strides = [1, 1]} : vector<2x512xf32> to vector<2x128xf32>
    %cst_34 = arith.constant 5.000000e-01 : f32
    %58 = vector.broadcast %cst_34 : f32 to vector<2x128xf32>
    %59 = arith.mulf %58, %57 : vector<2x128xf32>
    %60 = math.tanh %59 : vector<2x128xf32>
    %cst_35 = arith.constant 5.000000e-01 : f32
    %61 = vector.broadcast %cst_35 : f32 to vector<2x128xf32>
    %62 = arith.mulf %61, %60 : vector<2x128xf32>
    %cst_36 = arith.constant 5.000000e-01 : f32
    %63 = vector.broadcast %cst_36 : f32 to vector<2x128xf32>
    %64 = arith.addf %62, %63 : vector<2x128xf32>
    %65 = vector.extract_strided_slice %56 {offsets = [0, 128], sizes = [2, 128], strides = [1, 1]} : vector<2x512xf32> to vector<2x128xf32>
    %cst_37 = arith.constant 5.000000e-01 : f32
    %66 = vector.broadcast %cst_37 : f32 to vector<2x128xf32>
    %67 = arith.mulf %66, %65 : vector<2x128xf32>
    %68 = math.tanh %67 : vector<2x128xf32>
    %cst_38 = arith.constant 5.000000e-01 : f32
    %69 = vector.broadcast %cst_38 : f32 to vector<2x128xf32>
    %70 = arith.mulf %69, %68 : vector<2x128xf32>
    %cst_39 = arith.constant 5.000000e-01 : f32
    %71 = vector.broadcast %cst_39 : f32 to vector<2x128xf32>
    %72 = arith.addf %70, %71 : vector<2x128xf32>
    %73 = vector.extract_strided_slice %56 {offsets = [0, 256], sizes = [2, 128], strides = [1, 1]} : vector<2x512xf32> to vector<2x128xf32>
    %74 = math.tanh %73 : vector<2x128xf32>
    %75 = vector.extract_strided_slice %56 {offsets = [0, 384], sizes = [2, 128], strides = [1, 1]} : vector<2x512xf32> to vector<2x128xf32>
    %cst_40 = arith.constant 5.000000e-01 : f32
    %76 = vector.broadcast %cst_40 : f32 to vector<2x128xf32>
    %77 = arith.mulf %76, %75 : vector<2x128xf32>
    %78 = math.tanh %77 : vector<2x128xf32>
    %cst_41 = arith.constant 5.000000e-01 : f32
    %79 = vector.broadcast %cst_41 : f32 to vector<2x128xf32>
    %80 = arith.mulf %79, %78 : vector<2x128xf32>
    %cst_42 = arith.constant 5.000000e-01 : f32
    %81 = vector.broadcast %cst_42 : f32 to vector<2x128xf32>
    %82 = arith.addf %80, %81 : vector<2x128xf32>
    %83 = arith.mulf %72, %48 : vector<2x128xf32>
    %84 = arith.mulf %64, %74 : vector<2x128xf32>
    %85 = arith.addf %83, %84 : vector<2x128xf32>
    %86 = math.tanh %85 : vector<2x128xf32>
    %87 = arith.mulf %82, %86 : vector<2x128xf32>
    %c2_i32 = arith.constant 2 : i32
    %88 = arith.index_cast %c2_i32 : i32 to index
    %c0_43 = arith.constant 0 : index
    %c0_44 = arith.constant 0 : index
    %89 = vector.load %arg18[%88, %c0_43, %c0_44] : memref<8x2x512xf32, #tpu.memory_space<vmem>>, vector<1x2x512xf32>
    %90 = vector.shape_cast %89 : vector<1x2x512xf32> to vector<2x512xf32>
    %c0_45 = arith.constant 0 : index
    %c0_46 = arith.constant 0 : index
    %91 = vector.load %arg5[%c0_45, %c0_46] : memref<128x512xf32, #tpu.memory_space<vmem>>, vector<128x512xf32>
    %cst_47 = arith.constant dense<0.000000e+00> : vector<2x512xf32>
    %92 = tpu.matmul %87, %91, %cst_47 {dimension_numbers = #tpu.dot_dimension_numbers<[1], [0], [0], [1], [0, 0, 1, 1], [], []>} : vector<2x128xf32>, vector<128x512xf32>, vector<2x512xf32> -> vector<2x512xf32>
    %93 = arith.addf %90, %92 : vector<2x512xf32>
    %94 = vector.extract_strided_slice %93 {offsets = [0, 0], sizes = [2, 128], strides = [1, 1]} : vector<2x512xf32> to vector<2x128xf32>
    %cst_48 = arith.constant 5.000000e-01 : f32
    %95 = vector.broadcast %cst_48 : f32 to vector<2x128xf32>
    %96 = arith.mulf %95, %94 : vector<2x128xf32>
    %97 = math.tanh %96 : vector<2x128xf32>
    %cst_49 = arith.constant 5.000000e-01 : f32
    %98 = vector.broadcast %cst_49 : f32 to vector<2x128xf32>
    %99 = arith.mulf %98, %97 : vector<2x128xf32>
    %cst_50 = arith.constant 5.000000e-01 : f32
    %100 = vector.broadcast %cst_50 : f32 to vector<2x128xf32>
    %101 = arith.addf %99, %100 : vector<2x128xf32>
    %102 = vector.extract_strided_slice %93 {offsets = [0, 128], sizes = [2, 128], strides = [1, 1]} : vector<2x512xf32> to vector<2x128xf32>
    %cst_51 = arith.constant 5.000000e-01 : f32
    %103 = vector.broadcast %cst_51 : f32 to vector<2x128xf32>
    %104 = arith.mulf %103, %102 : vector<2x128xf32>
    %105 = math.tanh %104 : vector<2x128xf32>
    %cst_52 = arith.constant 5.000000e-01 : f32
    %106 = vector.broadcast %cst_52 : f32 to vector<2x128xf32>
    %107 = arith.mulf %106, %105 : vector<2x128xf32>
    %cst_53 = arith.constant 5.000000e-01 : f32
    %108 = vector.broadcast %cst_53 : f32 to vector<2x128xf32>
    %109 = arith.addf %107, %108 : vector<2x128xf32>
    %110 = vector.extract_strided_slice %93 {offsets = [0, 256], sizes = [2, 128], strides = [1, 1]} : vector<2x512xf32> to vector<2x128xf32>
    %111 = math.tanh %110 : vector<2x128xf32>
    %112 = vector.extract_strided_slice %93 {offsets = [0, 384], sizes = [2, 128], strides = [1, 1]} : vector<2x512xf32> to vector<2x128xf32>
    %cst_54 = arith.constant 5.000000e-01 : f32
    %113 = vector.broadcast %cst_54 : f32 to vector<2x128xf32>
    %114 = arith.mulf %113, %112 : vector<2x128xf32>
    %115 = math.tanh %114 : vector<2x128xf32>
    %cst_55 = arith.constant 5.000000e-01 : f32
    %116 = vector.broadcast %cst_55 : f32 to vector<2x128xf32>
    %117 = arith.mulf %116, %115 : vector<2x128xf32>
    %cst_56 = arith.constant 5.000000e-01 : f32
    %118 = vector.broadcast %cst_56 : f32 to vector<2x128xf32>
    %119 = arith.addf %117, %118 : vector<2x128xf32>
    %120 = arith.mulf %109, %85 : vector<2x128xf32>
    %121 = arith.mulf %101, %111 : vector<2x128xf32>
    %122 = arith.addf %120, %121 : vector<2x128xf32>
    %123 = math.tanh %122 : vector<2x128xf32>
    %124 = arith.mulf %119, %123 : vector<2x128xf32>
    %c3_i32 = arith.constant 3 : i32
    %125 = arith.index_cast %c3_i32 : i32 to index
    %c0_57 = arith.constant 0 : index
    %c0_58 = arith.constant 0 : index
    %126 = vector.load %arg18[%125, %c0_57, %c0_58] : memref<8x2x512xf32, #tpu.memory_space<vmem>>, vector<1x2x512xf32>
    %127 = vector.shape_cast %126 : vector<1x2x512xf32> to vector<2x512xf32>
    %c0_59 = arith.constant 0 : index
    %c0_60 = arith.constant 0 : index
    %128 = vector.load %arg5[%c0_59, %c0_60] : memref<128x512xf32, #tpu.memory_space<vmem>>, vector<128x512xf32>
    %cst_61 = arith.constant dense<0.000000e+00> : vector<2x512xf32>
    %129 = tpu.matmul %124, %128, %cst_61 {dimension_numbers = #tpu.dot_dimension_numbers<[1], [0], [0], [1], [0, 0, 1, 1], [], []>} : vector<2x128xf32>, vector<128x512xf32>, vector<2x512xf32> -> vector<2x512xf32>
    %130 = arith.addf %127, %129 : vector<2x512xf32>
    %131 = vector.extract_strided_slice %130 {offsets = [0, 0], sizes = [2, 128], strides = [1, 1]} : vector<2x512xf32> to vector<2x128xf32>
    %cst_62 = arith.constant 5.000000e-01 : f32
    %132 = vector.broadcast %cst_62 : f32 to vector<2x128xf32>
    %133 = arith.mulf %132, %131 : vector<2x128xf32>
    %134 = math.tanh %133 : vector<2x128xf32>
    %cst_63 = arith.constant 5.000000e-01 : f32
    %135 = vector.broadcast %cst_63 : f32 to vector<2x128xf32>
    %136 = arith.mulf %135, %134 : vector<2x128xf32>
    %cst_64 = arith.constant 5.000000e-01 : f32
    %137 = vector.broadcast %cst_64 : f32 to vector<2x128xf32>
    %138 = arith.addf %136, %137 : vector<2x128xf32>
    %139 = vector.extract_strided_slice %130 {offsets = [0, 128], sizes = [2, 128], strides = [1, 1]} : vector<2x512xf32> to vector<2x128xf32>
    %cst_65 = arith.constant 5.000000e-01 : f32
    %140 = vector.broadcast %cst_65 : f32 to vector<2x128xf32>
    %141 = arith.mulf %140, %139 : vector<2x128xf32>
    %142 = math.tanh %141 : vector<2x128xf32>
    %cst_66 = arith.constant 5.000000e-01 : f32
    %143 = vector.broadcast %cst_66 : f32 to vector<2x128xf32>
    %144 = arith.mulf %143, %142 : vector<2x128xf32>
    %cst_67 = arith.constant 5.000000e-01 : f32
    %145 = vector.broadcast %cst_67 : f32 to vector<2x128xf32>
    %146 = arith.addf %144, %145 : vector<2x128xf32>
    %147 = vector.extract_strided_slice %130 {offsets = [0, 256], sizes = [2, 128], strides = [1, 1]} : vector<2x512xf32> to vector<2x128xf32>
    %148 = math.tanh %147 : vector<2x128xf32>
    %149 = vector.extract_strided_slice %130 {offsets = [0, 384], sizes = [2, 128], strides = [1, 1]} : vector<2x512xf32> to vector<2x128xf32>
    %cst_68 = arith.constant 5.000000e-01 : f32
    %150 = vector.broadcast %cst_68 : f32 to vector<2x128xf32>
    %151 = arith.mulf %150, %149 : vector<2x128xf32>
    %152 = math.tanh %151 : vector<2x128xf32>
    %cst_69 = arith.constant 5.000000e-01 : f32
    %153 = vector.broadcast %cst_69 : f32 to vector<2x128xf32>
    %154 = arith.mulf %153, %152 : vector<2x128xf32>
    %cst_70 = arith.constant 5.000000e-01 : f32
    %155 = vector.broadcast %cst_70 : f32 to vector<2x128xf32>
    %156 = arith.addf %154, %155 : vector<2x128xf32>
    %157 = arith.mulf %146, %122 : vector<2x128xf32>
    %158 = arith.mulf %138, %148 : vector<2x128xf32>
    %159 = arith.addf %157, %158 : vector<2x128xf32>
    %160 = math.tanh %159 : vector<2x128xf32>
    %161 = arith.mulf %156, %160 : vector<2x128xf32>
    %c4_i32 = arith.constant 4 : i32
    %162 = arith.index_cast %c4_i32 : i32 to index
    %c0_71 = arith.constant 0 : index
    %c0_72 = arith.constant 0 : index
    %163 = vector.load %arg18[%162, %c0_71, %c0_72] : memref<8x2x512xf32, #tpu.memory_space<vmem>>, vector<1x2x512xf32>
    %164 = vector.shape_cast %163 : vector<1x2x512xf32> to vector<2x512xf32>
    %c0_73 = arith.constant 0 : index
    %c0_74 = arith.constant 0 : index
    %165 = vector.load %arg5[%c0_73, %c0_74] : memref<128x512xf32, #tpu.memory_space<vmem>>, vector<128x512xf32>
    %cst_75 = arith.constant dense<0.000000e+00> : vector<2x512xf32>
    %166 = tpu.matmul %161, %165, %cst_75 {dimension_numbers = #tpu.dot_dimension_numbers<[1], [0], [0], [1], [0, 0, 1, 1], [], []>} : vector<2x128xf32>, vector<128x512xf32>, vector<2x512xf32> -> vector<2x512xf32>
    %167 = arith.addf %164, %166 : vector<2x512xf32>
    %168 = vector.extract_strided_slice %167 {offsets = [0, 0], sizes = [2, 128], strides = [1, 1]} : vector<2x512xf32> to vector<2x128xf32>
    %cst_76 = arith.constant 5.000000e-01 : f32
    %169 = vector.broadcast %cst_76 : f32 to vector<2x128xf32>
    %170 = arith.mulf %169, %168 : vector<2x128xf32>
    %171 = math.tanh %170 : vector<2x128xf32>
    %cst_77 = arith.constant 5.000000e-01 : f32
    %172 = vector.broadcast %cst_77 : f32 to vector<2x128xf32>
    %173 = arith.mulf %172, %171 : vector<2x128xf32>
    %cst_78 = arith.constant 5.000000e-01 : f32
    %174 = vector.broadcast %cst_78 : f32 to vector<2x128xf32>
    %175 = arith.addf %173, %174 : vector<2x128xf32>
    %176 = vector.extract_strided_slice %167 {offsets = [0, 128], sizes = [2, 128], strides = [1, 1]} : vector<2x512xf32> to vector<2x128xf32>
    %cst_79 = arith.constant 5.000000e-01 : f32
    %177 = vector.broadcast %cst_79 : f32 to vector<2x128xf32>
    %178 = arith.mulf %177, %176 : vector<2x128xf32>
    %179 = math.tanh %178 : vector<2x128xf32>
    %cst_80 = arith.constant 5.000000e-01 : f32
    %180 = vector.broadcast %cst_80 : f32 to vector<2x128xf32>
    %181 = arith.mulf %180, %179 : vector<2x128xf32>
    %cst_81 = arith.constant 5.000000e-01 : f32
    %182 = vector.broadcast %cst_81 : f32 to vector<2x128xf32>
    %183 = arith.addf %181, %182 : vector<2x128xf32>
    %184 = vector.extract_strided_slice %167 {offsets = [0, 256], sizes = [2, 128], strides = [1, 1]} : vector<2x512xf32> to vector<2x128xf32>
    %185 = math.tanh %184 : vector<2x128xf32>
    %186 = vector.extract_strided_slice %167 {offsets = [0, 384], sizes = [2, 128], strides = [1, 1]} : vector<2x512xf32> to vector<2x128xf32>
    %cst_82 = arith.constant 5.000000e-01 : f32
    %187 = vector.broadcast %cst_82 : f32 to vector<2x128xf32>
    %188 = arith.mulf %187, %186 : vector<2x128xf32>
    %189 = math.tanh %188 : vector<2x128xf32>
    %cst_83 = arith.constant 5.000000e-01 : f32
    %190 = vector.broadcast %cst_83 : f32 to vector<2x128xf32>
    %191 = arith.mulf %190, %189 : vector<2x128xf32>
    %cst_84 = arith.constant 5.000000e-01 : f32
    %192 = vector.broadcast %cst_84 : f32 to vector<2x128xf32>
    %193 = arith.addf %191, %192 : vector<2x128xf32>
    %194 = arith.mulf %183, %159 : vector<2x128xf32>
    %195 = arith.mulf %175, %185 : vector<2x128xf32>
    %196 = arith.addf %194, %195 : vector<2x128xf32>
    %197 = math.tanh %196 : vector<2x128xf32>
    %198 = arith.mulf %193, %197 : vector<2x128xf32>
    %c5_i32 = arith.constant 5 : i32
    %199 = arith.index_cast %c5_i32 : i32 to index
    %c0_85 = arith.constant 0 : index
    %c0_86 = arith.constant 0 : index
    %200 = vector.load %arg18[%199, %c0_85, %c0_86] : memref<8x2x512xf32, #tpu.memory_space<vmem>>, vector<1x2x512xf32>
    %201 = vector.shape_cast %200 : vector<1x2x512xf32> to vector<2x512xf32>
    %c0_87 = arith.constant 0 : index
    %c0_88 = arith.constant 0 : index
    %202 = vector.load %arg5[%c0_87, %c0_88] : memref<128x512xf32, #tpu.memory_space<vmem>>, vector<128x512xf32>
    %cst_89 = arith.constant dense<0.000000e+00> : vector<2x512xf32>
    %203 = tpu.matmul %198, %202, %cst_89 {dimension_numbers = #tpu.dot_dimension_numbers<[1], [0], [0], [1], [0, 0, 1, 1], [], []>} : vector<2x128xf32>, vector<128x512xf32>, vector<2x512xf32> -> vector<2x512xf32>
    %204 = arith.addf %201, %203 : vector<2x512xf32>
    %205 = vector.extract_strided_slice %204 {offsets = [0, 0], sizes = [2, 128], strides = [1, 1]} : vector<2x512xf32> to vector<2x128xf32>
    %cst_90 = arith.constant 5.000000e-01 : f32
    %206 = vector.broadcast %cst_90 : f32 to vector<2x128xf32>
    %207 = arith.mulf %206, %205 : vector<2x128xf32>
    %208 = math.tanh %207 : vector<2x128xf32>
    %cst_91 = arith.constant 5.000000e-01 : f32
    %209 = vector.broadcast %cst_91 : f32 to vector<2x128xf32>
    %210 = arith.mulf %209, %208 : vector<2x128xf32>
    %cst_92 = arith.constant 5.000000e-01 : f32
    %211 = vector.broadcast %cst_92 : f32 to vector<2x128xf32>
    %212 = arith.addf %210, %211 : vector<2x128xf32>
    %213 = vector.extract_strided_slice %204 {offsets = [0, 128], sizes = [2, 128], strides = [1, 1]} : vector<2x512xf32> to vector<2x128xf32>
    %cst_93 = arith.constant 5.000000e-01 : f32
    %214 = vector.broadcast %cst_93 : f32 to vector<2x128xf32>
    %215 = arith.mulf %214, %213 : vector<2x128xf32>
    %216 = math.tanh %215 : vector<2x128xf32>
    %cst_94 = arith.constant 5.000000e-01 : f32
    %217 = vector.broadcast %cst_94 : f32 to vector<2x128xf32>
    %218 = arith.mulf %217, %216 : vector<2x128xf32>
    %cst_95 = arith.constant 5.000000e-01 : f32
    %219 = vector.broadcast %cst_95 : f32 to vector<2x128xf32>
    %220 = arith.addf %218, %219 : vector<2x128xf32>
    %221 = vector.extract_strided_slice %204 {offsets = [0, 256], sizes = [2, 128], strides = [1, 1]} : vector<2x512xf32> to vector<2x128xf32>
    %222 = math.tanh %221 : vector<2x128xf32>
    %223 = vector.extract_strided_slice %204 {offsets = [0, 384], sizes = [2, 128], strides = [1, 1]} : vector<2x512xf32> to vector<2x128xf32>
    %cst_96 = arith.constant 5.000000e-01 : f32
    %224 = vector.broadcast %cst_96 : f32 to vector<2x128xf32>
    %225 = arith.mulf %224, %223 : vector<2x128xf32>
    %226 = math.tanh %225 : vector<2x128xf32>
    %cst_97 = arith.constant 5.000000e-01 : f32
    %227 = vector.broadcast %cst_97 : f32 to vector<2x128xf32>
    %228 = arith.mulf %227, %226 : vector<2x128xf32>
    %cst_98 = arith.constant 5.000000e-01 : f32
    %229 = vector.broadcast %cst_98 : f32 to vector<2x128xf32>
    %230 = arith.addf %228, %229 : vector<2x128xf32>
    %231 = arith.mulf %220, %196 : vector<2x128xf32>
    %232 = arith.mulf %212, %222 : vector<2x128xf32>
    %233 = arith.addf %231, %232 : vector<2x128xf32>
    %234 = math.tanh %233 : vector<2x128xf32>
    %235 = arith.mulf %230, %234 : vector<2x128xf32>
    %c6_i32 = arith.constant 6 : i32
    %236 = arith.index_cast %c6_i32 : i32 to index
    %c0_99 = arith.constant 0 : index
    %c0_100 = arith.constant 0 : index
    %237 = vector.load %arg18[%236, %c0_99, %c0_100] : memref<8x2x512xf32, #tpu.memory_space<vmem>>, vector<1x2x512xf32>
    %238 = vector.shape_cast %237 : vector<1x2x512xf32> to vector<2x512xf32>
    %c0_101 = arith.constant 0 : index
    %c0_102 = arith.constant 0 : index
    %239 = vector.load %arg5[%c0_101, %c0_102] : memref<128x512xf32, #tpu.memory_space<vmem>>, vector<128x512xf32>
    %cst_103 = arith.constant dense<0.000000e+00> : vector<2x512xf32>
    %240 = tpu.matmul %235, %239, %cst_103 {dimension_numbers = #tpu.dot_dimension_numbers<[1], [0], [0], [1], [0, 0, 1, 1], [], []>} : vector<2x128xf32>, vector<128x512xf32>, vector<2x512xf32> -> vector<2x512xf32>
    %241 = arith.addf %238, %240 : vector<2x512xf32>
    %242 = vector.extract_strided_slice %241 {offsets = [0, 0], sizes = [2, 128], strides = [1, 1]} : vector<2x512xf32> to vector<2x128xf32>
    %cst_104 = arith.constant 5.000000e-01 : f32
    %243 = vector.broadcast %cst_104 : f32 to vector<2x128xf32>
    %244 = arith.mulf %243, %242 : vector<2x128xf32>
    %245 = math.tanh %244 : vector<2x128xf32>
    %cst_105 = arith.constant 5.000000e-01 : f32
    %246 = vector.broadcast %cst_105 : f32 to vector<2x128xf32>
    %247 = arith.mulf %246, %245 : vector<2x128xf32>
    %cst_106 = arith.constant 5.000000e-01 : f32
    %248 = vector.broadcast %cst_106 : f32 to vector<2x128xf32>
    %249 = arith.addf %247, %248 : vector<2x128xf32>
    %250 = vector.extract_strided_slice %241 {offsets = [0, 128], sizes = [2, 128], strides = [1, 1]} : vector<2x512xf32> to vector<2x128xf32>
    %cst_107 = arith.constant 5.000000e-01 : f32
    %251 = vector.broadcast %cst_107 : f32 to vector<2x128xf32>
    %252 = arith.mulf %251, %250 : vector<2x128xf32>
    %253 = math.tanh %252 : vector<2x128xf32>
    %cst_108 = arith.constant 5.000000e-01 : f32
    %254 = vector.broadcast %cst_108 : f32 to vector<2x128xf32>
    %255 = arith.mulf %254, %253 : vector<2x128xf32>
    %cst_109 = arith.constant 5.000000e-01 : f32
    %256 = vector.broadcast %cst_109 : f32 to vector<2x128xf32>
    %257 = arith.addf %255, %256 : vector<2x128xf32>
    %258 = vector.extract_strided_slice %241 {offsets = [0, 256], sizes = [2, 128], strides = [1, 1]} : vector<2x512xf32> to vector<2x128xf32>
    %259 = math.tanh %258 : vector<2x128xf32>
    %260 = vector.extract_strided_slice %241 {offsets = [0, 384], sizes = [2, 128], strides = [1, 1]} : vector<2x512xf32> to vector<2x128xf32>
    %cst_110 = arith.constant 5.000000e-01 : f32
    %261 = vector.broadcast %cst_110 : f32 to vector<2x128xf32>
    %262 = arith.mulf %261, %260 : vector<2x128xf32>
    %263 = math.tanh %262 : vector<2x128xf32>
    %cst_111 = arith.constant 5.000000e-01 : f32
    %264 = vector.broadcast %cst_111 : f32 to vector<2x128xf32>
    %265 = arith.mulf %264, %263 : vector<2x128xf32>
    %cst_112 = arith.constant 5.000000e-01 : f32
    %266 = vector.broadcast %cst_112 : f32 to vector<2x128xf32>
    %267 = arith.addf %265, %266 : vector<2x128xf32>
    %268 = arith.mulf %257, %233 : vector<2x128xf32>
    %269 = arith.mulf %249, %259 : vector<2x128xf32>
    %270 = arith.addf %268, %269 : vector<2x128xf32>
    %271 = math.tanh %270 : vector<2x128xf32>
    %272 = arith.mulf %267, %271 : vector<2x128xf32>
    %c7_i32 = arith.constant 7 : i32
    %273 = arith.index_cast %c7_i32 : i32 to index
    %c0_113 = arith.constant 0 : index
    %c0_114 = arith.constant 0 : index
    %274 = vector.load %arg18[%273, %c0_113, %c0_114] : memref<8x2x512xf32, #tpu.memory_space<vmem>>, vector<1x2x512xf32>
    %275 = vector.shape_cast %274 : vector<1x2x512xf32> to vector<2x512xf32>
    %c0_115 = arith.constant 0 : index
    %c0_116 = arith.constant 0 : index
    %276 = vector.load %arg5[%c0_115, %c0_116] : memref<128x512xf32, #tpu.memory_space<vmem>>, vector<128x512xf32>
    %cst_117 = arith.constant dense<0.000000e+00> : vector<2x512xf32>
    %277 = tpu.matmul %272, %276, %cst_117 {dimension_numbers = #tpu.dot_dimension_numbers<[1], [0], [0], [1], [0, 0, 1, 1], [], []>} : vector<2x128xf32>, vector<128x512xf32>, vector<2x512xf32> -> vector<2x512xf32>
    %278 = arith.addf %275, %277 : vector<2x512xf32>
    %279 = vector.extract_strided_slice %278 {offsets = [0, 0], sizes = [2, 128], strides = [1, 1]} : vector<2x512xf32> to vector<2x128xf32>
    %cst_118 = arith.constant 5.000000e-01 : f32
    %280 = vector.broadcast %cst_118 : f32 to vector<2x128xf32>
    %281 = arith.mulf %280, %279 : vector<2x128xf32>
    %282 = math.tanh %281 : vector<2x128xf32>
    %cst_119 = arith.constant 5.000000e-01 : f32
    %283 = vector.broadcast %cst_119 : f32 to vector<2x128xf32>
    %284 = arith.mulf %283, %282 : vector<2x128xf32>
    %cst_120 = arith.constant 5.000000e-01 : f32
    %285 = vector.broadcast %cst_120 : f32 to vector<2x128xf32>
    %286 = arith.addf %284, %285 : vector<2x128xf32>
    %287 = vector.extract_strided_slice %278 {offsets = [0, 128], sizes = [2, 128], strides = [1, 1]} : vector<2x512xf32> to vector<2x128xf32>
    %cst_121 = arith.constant 5.000000e-01 : f32
    %288 = vector.broadcast %cst_121 : f32 to vector<2x128xf32>
    %289 = arith.mulf %288, %287 : vector<2x128xf32>
    %290 = math.tanh %289 : vector<2x128xf32>
    %cst_122 = arith.constant 5.000000e-01 : f32
    %291 = vector.broadcast %cst_122 : f32 to vector<2x128xf32>
    %292 = arith.mulf %291, %290 : vector<2x128xf32>
    %cst_123 = arith.constant 5.000000e-01 : f32
    %293 = vector.broadcast %cst_123 : f32 to vector<2x128xf32>
    %294 = arith.addf %292, %293 : vector<2x128xf32>
    %295 = vector.extract_strided_slice %278 {offsets = [0, 256], sizes = [2, 128], strides = [1, 1]} : vector<2x512xf32> to vector<2x128xf32>
    %296 = math.tanh %295 : vector<2x128xf32>
    %297 = vector.extract_strided_slice %278 {offsets = [0, 384], sizes = [2, 128], strides = [1, 1]} : vector<2x512xf32> to vector<2x128xf32>
    %cst_124 = arith.constant 5.000000e-01 : f32
    %298 = vector.broadcast %cst_124 : f32 to vector<2x128xf32>
    %299 = arith.mulf %298, %297 : vector<2x128xf32>
    %300 = math.tanh %299 : vector<2x128xf32>
    %cst_125 = arith.constant 5.000000e-01 : f32
    %301 = vector.broadcast %cst_125 : f32 to vector<2x128xf32>
    %302 = arith.mulf %301, %300 : vector<2x128xf32>
    %cst_126 = arith.constant 5.000000e-01 : f32
    %303 = vector.broadcast %cst_126 : f32 to vector<2x128xf32>
    %304 = arith.addf %302, %303 : vector<2x128xf32>
    %305 = arith.mulf %294, %270 : vector<2x128xf32>
    %306 = arith.mulf %286, %296 : vector<2x128xf32>
    %307 = arith.addf %305, %306 : vector<2x128xf32>
    %308 = math.tanh %307 : vector<2x128xf32>
    %309 = arith.mulf %304, %308 : vector<2x128xf32>
    %c8_i32 = arith.constant 8 : i32
    %c0_127 = arith.constant 0 : index
    %c0_128 = arith.constant 0 : index
    %310 = vector.load %arg19[%c0_127, %c0_128] : memref<2x128xf32, #tpu.memory_space<vmem>>, vector<2x128xf32>
    tpu.vector_store %arg19[%c0_127, %c0_128], %309 {strides = array<i32>} : memref<2x128xf32, #tpu.memory_space<vmem>>, vector<2x128xf32>,
    %c0_129 = arith.constant 0 : index
    %c0_130 = arith.constant 0 : index
    %311 = vector.load %arg20[%c0_129, %c0_130] : memref<2x128xf32, #tpu.memory_space<vmem>>, vector<2x128xf32>
    tpu.vector_store %arg20[%c0_129, %c0_130], %307 {strides = array<i32>} : memref<2x128xf32, #tpu.memory_space<vmem>>, vector<2x128xf32>,
    %c0_i32_131 = arith.constant 0 : i32
    %312 = arith.cmpi eq, %arg1, %c0_i32_131 : i32
    %313 = arith.extui %312 : i1 to i32
    %c0_i32_132 = arith.constant 0 : i32
    %314 = arith.cmpi ne, %313, %c0_i32_132 : i32
    scf.if %314 {
      %c0_133 = arith.constant 0 : index
      %c0_134 = arith.constant 0 : index
      %315 = vector.load %arg7[%c0_133, %c0_134] : memref<128x512xf32, #tpu.memory_space<vmem>>, vector<128x512xf32>
      %cst_135 = arith.constant dense<0.000000e+00> : vector<2x512xf32>
      %316 = tpu.matmul %309, %315, %cst_135 {dimension_numbers = #tpu.dot_dimension_numbers<[1], [0], [0], [1], [0, 0, 1, 1], [], []>} : vector<2x128xf32>, vector<128x512xf32>, vector<2x512xf32> -> vector<2x512xf32>
      %c0_136 = arith.constant 0 : index
      %c0_137 = arith.constant 0 : index
      %317 = vector.load %arg8[%c0_136, %c0_137] : memref<1x512xf32, #tpu.memory_space<vmem>>, vector<1x512xf32>
      %318 = vector.broadcast %317 : vector<1x512xf32> to vector<2x512xf32>
      %319 = arith.addf %316, %318 : vector<2x512xf32>
      %c0_138 = arith.constant 0 : index
      %c0_139 = arith.constant 0 : index
      %320 = vector.load %arg3[%c0_138, %c0_139] : memref<2x32xf32, #tpu.memory_space<vmem>>, vector<2x32xf32>
      %c0_140 = arith.constant 0 : index
      %c0_141 = arith.constant 0 : index
      %321 = vector.load %arg9[%c0_140, %c0_141] : memref<32x512xf32, #tpu.memory_space<vmem>>, vector<32x512xf32>
      %cst_142 = arith.constant dense<0.000000e+00> : vector<2x512xf32>
      %322 = tpu.matmul %320, %321, %cst_142 {dimension_numbers = #tpu.dot_dimension_numbers<[1], [0], [0], [1], [0, 0, 1, 1], [], []>} : vector<2x32xf32>, vector<32x512xf32>, vector<2x512xf32> -> vector<2x512xf32>
      %c0_143 = arith.constant 0 : index
      %c0_144 = arith.constant 0 : index
      %323 = vector.load %arg10[%c0_143, %c0_144] : memref<1x512xf32, #tpu.memory_space<vmem>>, vector<1x512xf32>
      %324 = vector.broadcast %323 : vector<1x512xf32> to vector<2x512xf32>
      %325 = arith.addf %322, %324 : vector<2x512xf32>
      %c0_145 = arith.constant 0 : index
      %c0_146 = arith.constant 0 : index
      %326 = vector.load %arg15[%c0_145, %c0_146] : memref<1x1xf32, #tpu.memory_space<vmem>>, vector<1x1xf32>
      %c0_147 = arith.constant 0 : index
      %c0_148 = arith.constant 0 : index
      %327 = vector.load %arg11[%c0_147, %c0_148] : memref<1x512xf32, #tpu.memory_space<vmem>>, vector<1x512xf32>
      %328 = vector.broadcast %326 : vector<1x1xf32> to vector<1x512xf32>
      %329 = arith.mulf %328, %327 : vector<1x512xf32>
      %c0_149 = arith.constant 0 : index
      %c0_150 = arith.constant 0 : index
      %330 = vector.load %arg16[%c0_149, %c0_150] : memref<1x1xf32, #tpu.memory_space<vmem>>, vector<1x1xf32>
      %c0_151 = arith.constant 0 : index
      %c0_152 = arith.constant 0 : index
      %331 = vector.load %arg13[%c0_151, %c0_152] : memref<1x512xf32, #tpu.memory_space<vmem>>, vector<1x512xf32>
      %332 = vector.broadcast %330 : vector<1x1xf32> to vector<1x512xf32>
      %333 = arith.mulf %332, %331 : vector<1x512xf32>
      %c0_153 = arith.constant 0 : index
      %c0_154 = arith.constant 0 : index
      %334 = vector.load %arg15[%c0_153, %c0_154] : memref<1x1xf32, #tpu.memory_space<vmem>>, vector<1x1xf32>
      %c0_155 = arith.constant 0 : index
      %c0_156 = arith.constant 0 : index
      %335 = vector.load %arg12[%c0_155, %c0_156] : memref<1x1xf32, #tpu.memory_space<vmem>>, vector<1x1xf32>
      %336 = arith.mulf %334, %335 : vector<1x1xf32>
      %c0_157 = arith.constant 0 : index
      %c0_158 = arith.constant 0 : index
      %337 = vector.load %arg16[%c0_157, %c0_158] : memref<1x1xf32, #tpu.memory_space<vmem>>, vector<1x1xf32>
      %c0_159 = arith.constant 0 : index
      %c0_160 = arith.constant 0 : index
      %338 = vector.load %arg14[%c0_159, %c0_160] : memref<1x1xf32, #tpu.memory_space<vmem>>, vector<1x1xf32>
      %339 = arith.mulf %337, %338 : vector<1x1xf32>
      %340 = arith.addf %336, %339 : vector<1x1xf32>
      %341 = vector.broadcast %329 : vector<1x512xf32> to vector<2x512xf32>
      %342 = arith.mulf %319, %341 : vector<2x512xf32>
      %343 = vector.broadcast %333 : vector<1x512xf32> to vector<2x512xf32>
      %344 = arith.mulf %325, %343 : vector<2x512xf32>
      %345 = arith.addf %342, %344 : vector<2x512xf32>
      %cst_161 = arith.constant dense<0.000000e+00> : vector<2xf32>
      %346 = vector.multi_reduction <add>, %345, %cst_161 [1] : vector<2x512xf32> to vector<2xf32>
      %347 = vector.shape_cast %346 : vector<2xf32> to vector<2x1xf32>
      %348 = vector.broadcast %340 : vector<1x1xf32> to vector<2x1xf32>
      %349 = arith.addf %347, %348 : vector<2x1xf32>
      %cst_162 = arith.constant 5.000000e-01 : f32
      %350 = vector.broadcast %cst_162 : f32 to vector<2x1xf32>
      %351 = arith.mulf %350, %349 : vector<2x1xf32>
      %352 = math.tanh %351 : vector<2x1xf32>
      %cst_163 = arith.constant 5.000000e-01 : f32
      %353 = vector.broadcast %cst_163 : f32 to vector<2x1xf32>
      %354 = arith.mulf %353, %352 : vector<2x1xf32>
      %cst_164 = arith.constant 5.000000e-01 : f32
      %355 = vector.broadcast %cst_164 : f32 to vector<2x1xf32>
      %356 = arith.addf %354, %355 : vector<2x1xf32>
      %c0_165 = arith.constant 0 : index
      %c0_166 = arith.constant 0 : index
      %357 = vector.load %arg17[%c0_165, %c0_166] : memref<2x1xf32, #tpu.memory_space<vmem>>, vector<2x1xf32>
      tpu.vector_store %arg17[%c0_165, %c0_166], %356 {strides = array<i32>} : memref<2x1xf32, #tpu.memory_space<vmem>>, vector<2x1xf32>,
    } else {
    }
    return
  }
  func.func @transform_0(%arg0: i32, %arg1: i32) -> (i32, i32, i32) {
    %c0_i32 = arith.constant 0 : i32
    %c0_i32_0 = arith.constant 0 : i32
    return %arg1, %arg0, %c0_i32 : i32, i32, i32
  }
  func.func @transform_1(%arg0: i32, %arg1: i32) -> (i32, i32) {
    %c0_i32 = arith.constant 0 : i32
    %c0_i32_0 = arith.constant 0 : i32
    return %arg0, %c0_i32 : i32, i32
  }
  func.func @transform_2(%arg0: i32, %arg1: i32) -> (i32, i32) {
    %c0_i32 = arith.constant 0 : i32
    %c0_i32_0 = arith.constant 0 : i32
    %c0_i32_1 = arith.constant 0 : i32
    return %c0_i32, %c0_i32_0 : i32, i32
  }
  func.func @transform_3(%arg0: i32, %arg1: i32) -> (i32, i32) {
    %c0_i32 = arith.constant 0 : i32
    %c0_i32_0 = arith.constant 0 : i32
    %c0_i32_1 = arith.constant 0 : i32
    return %c0_i32, %c0_i32_0 : i32, i32
  }
  func.func @transform_4(%arg0: i32, %arg1: i32) -> (i32, i32) {
    %c0_i32 = arith.constant 0 : i32
    %c0_i32_0 = arith.constant 0 : i32
    %c0_i32_1 = arith.constant 0 : i32
    return %c0_i32, %c0_i32_0 : i32, i32
  }
  func.func @transform_5(%arg0: i32, %arg1: i32) -> (i32, i32) {
    %c0_i32 = arith.constant 0 : i32
    %c0_i32_0 = arith.constant 0 : i32
    %c0_i32_1 = arith.constant 0 : i32
    return %c0_i32, %c0_i32_0 : i32, i32
  }
  func.func @transform_6(%arg0: i32, %arg1: i32) -> (i32, i32) {
    %c0_i32 = arith.constant 0 : i32
    %c0_i32_0 = arith.constant 0 : i32
    %c0_i32_1 = arith.constant 0 : i32
    return %c0_i32, %c0_i32_0 : i32, i32
  }
  func.func @transform_7(%arg0: i32, %arg1: i32) -> (i32, i32) {
    %c0_i32 = arith.constant 0 : i32
    %c0_i32_0 = arith.constant 0 : i32
    %c0_i32_1 = arith.constant 0 : i32
    return %c0_i32, %c0_i32_0 : i32, i32
  }
  func.func @transform_8(%arg0: i32, %arg1: i32) -> (i32, i32) {
    %c0_i32 = arith.constant 0 : i32
    %c0_i32_0 = arith.constant 0 : i32
    %c0_i32_1 = arith.constant 0 : i32
    return %c0_i32, %c0_i32_0 : i32, i32
  }
  func.func @transform_9(%arg0: i32, %arg1: i32) -> (i32, i32) {
    %c0_i32 = arith.constant 0 : i32
    %c0_i32_0 = arith.constant 0 : i32
    %c0_i32_1 = arith.constant 0 : i32
    return %c0_i32, %c0_i32_0 : i32, i32
  }
  func.func @transform_10(%arg0: i32, %arg1: i32) -> (i32, i32) {
    %c0_i32 = arith.constant 0 : i32
    %c0_i32_0 = arith.constant 0 : i32
    %c0_i32_1 = arith.constant 0 : i32
    return %c0_i32, %c0_i32_0 : i32, i32
  }
  func.func @transform_11(%arg0: i32, %arg1: i32) -> (i32, i32) {
    %c0_i32 = arith.constant 0 : i32
    %c0_i32_0 = arith.constant 0 : i32
    %c0_i32_1 = arith.constant 0 : i32
    return %c0_i32, %c0_i32_0 : i32, i32
  }
  func.func @transform_12(%arg0: i32, %arg1: i32) -> (i32, i32) {
    %c0_i32 = arith.constant 0 : i32
    %c0_i32_0 = arith.constant 0 : i32
    %c0_i32_1 = arith.constant 0 : i32
    return %c0_i32, %c0_i32_0 : i32, i32
  }
  func.func @transform_13(%arg0: i32, %arg1: i32) -> (i32, i32) {
    %c0_i32 = arith.constant 0 : i32
    %c0_i32_0 = arith.constant 0 : i32
    %c0_i32_1 = arith.constant 0 : i32
    return %c0_i32, %c0_i32_0 : i32, i32
  }
  func.func @transform_14(%arg0: i32, %arg1: i32) -> (i32, i32) {
    %c0_i32 = arith.constant 0 : i32
    %c0_i32_0 = arith.constant 0 : i32
    %c0_i32_1 = arith.constant 0 : i32
    return %c0_i32, %c0_i32_0 : i32, i32
  }
  func.func @transform_15(%arg0: i32, %arg1: i32) -> (i32, i32) {
    %c0_i32 = arith.constant 0 : i32
    %c0_i32_0 = arith.constant 0 : i32
    return %arg0, %c0_i32 : i32, i32
  }
}

</mosaic_0001>

<bundles_post_ra>
// kernel: tpu_custom_call.1
= control target key start
LH: loop header
LB: loop body
LE: loop exit
PB: predicated region body
PF: predicated region fallthrough
CT: control target
= control target key end

     0   :  { %s4151_s0 = inlined_call_operand.hbm [shape: f32[8,2,32], index: 0, kind: input, shape index: {}]   ;;  %s4152_s1 = inlined_call_operand.vmem [shape: f32[2,32], index: 1, kind: input, shape index: {}]   ;;  %s4153_s2 = inlined_call_operand.hbm [shape: f32[32,512], index: 2, kind: input, shape index: {}]   ;;  %s4154_s3 = inlined_call_operand.hbm [shape: f32[128,512], index: 3, kind: input, shape index: {}]   ;;  %s4155_s4 = inlined_call_operand.vmem [shape: f32[1,512], index: 4, kind: input, shape index: {}]   ;;  %s4156_s5 = inlined_call_operand.hbm [shape: f32[128,512], index: 5, kind: input, shape index: {}]   ;;  %s4157_s6 = inlined_call_operand.vmem [shape: f32[1,512], index: 6, kind: input, shape index: {}]   ;;  %s4158_s7 = inlined_call_operand.hbm [shape: f32[32,512], index: 7, kind: input, shape index: {}]   ;;  %s4159_s8 = inlined_call_operand.vmem [shape: f32[1,512], index: 8, kind: input, shape index: {}]   ;;  %s4160_s9 = inlined_call_operand.vmem [shape: f32[1,512], index: 9, kind: input, shape index: {}]   ;;  %s4161_s10 = inlined_call_operand.<no memory space> [shape: f32[1,1], index: 10, kind: input, shape index: {}]   ;;  %s4162_s11 = inlined_call_operand.vmem [shape: f32[1,512], index: 11, kind: input, shape index: {}]   ;;  %s4163_s15 = inlined_call_operand.vmem [shape: f32[2,1], index: 15, kind: output, shape index: {}]   ;;  %s4164_s12 = inlined_call_operand.<no memory space> [shape: f32[1,1], index: 12, kind: input, shape index: {}]   ;;  %s4165_s13 = inlined_call_operand.<no memory space> [shape: f32[1,1], index: 13, kind: input, shape index: {}]   ;;  %s4166_s14 = inlined_call_operand.<no memory space> [shape: f32[1,1], index: 14, kind: input, shape index: {}]  }
   0x1   :  { %v20_v0 = vstv %s4161_s10  ;;  %v22_v1 = vstv %s4164_s12  ;;  %v24_v2 = vstv %s4165_s13  ;;  %v26_v3 = vstv %s4166_s14 }
   0x2   :  { %21 = vst [vmem:[#allocation5] sm:$0x1] %v20_v0  ;;  %23 = vst [vmem:[#allocation6] sm:$0x1] %v22_v1 }
   0x3   :  { %25 = vst [vmem:[#allocation7] sm:$0x1] %v24_v2  ;;  %27 = vst [vmem:[#allocation8] sm:$0x1] %v26_v3 }
   0x4   :  { %28 = vsyncpa [#allocation10], 0 }
   0x5   :  { %29 = vsyncpa [#allocation12], 0 }
   0x6   :  { %30 = vsyncpa [#allocation15], 0  ;;  %s3430_s10 = smov [#allocation11]   ;;  %s3314_s28 = scalar_lea.hbm %s4153_s2, 2048 }
   0x7   :  { %s50_s26 = sshll.u32 %s3430_s10, 4  ;;  %p3315_p0 = scmp.ne.s32.totalorder %s4153_s2, %s3314_s28  ;;  %s51_s26 = int_to_ptr.vmem [resolvable:$true] %s50_s26 }
   0x8   :  { %p3318_p1 = scmp.lt.u32.totalorder %s3314_s28, %s4153_s2 }
   0xa   :  { %p3320_p2 = pnand %p3318_p1, %p3315_p0 }
   0xc   :  { %3323 = shalt.err (!%p3320_p2)
}
   0xd   :  { %s3324_s16 = scalar_lea.vmem %s51_s26, 2048  ;;  %p3329_p4 = scmp.lt.s32.totalorder %s51_s26, %s51_s26 }
   0xe   :  { %p3325_p3 = scmp.ne.s32.totalorder %s51_s26, %s3324_s16  ;;  %p3330_p5 = scmp.lt.s32.totalorder %s3324_s16, %s3324_s16 }
  0x10   :  { %p3331_p6 = por %p3330_p5, %p3329_p4 }
  0x12   :  { %p3332_p7 = pnand %p3331_p6, %p3325_p3 }
  0x14   :  { %3335 = shalt.err (!%p3332_p7)
}
  0x15   :  { %s3431_s17 = smov 512   ;;  %s3432_s18 = smov 32  }
  0x16   :  { %56 = dma.hbm_to_vmem [thread:$0]  %s4153_s2, 2048, %s51_s26, [#allocation12], %s3431_s17, %s3431_s17, %s3432_s18  }
  0x17   :  { %s3433_s21 = smov [#allocation14]   ;;  %s3434_s23 = smov [#allocation9]  }
  0x18   :  { %s76_s22 = sshll.u32 %s3433_s21, 4  ;;  %s36_s24 = sshll.u32 %s3434_s23, 4  ;;  %s77_s22 = int_to_ptr.vmem [resolvable:$true] %s76_s22  ;;  %s37_s24 = int_to_ptr.vmem [resolvable:$true] %s36_s24 }
  0x19   :  { %s3336_s27 = scalar_lea.hbm %s4156_s5, 8192 }
  0x1a   :  { %p3337_p8 = scmp.ne.s32.totalorder %s4156_s5, %s3336_s27  ;;  %p3340_p9 = scmp.lt.u32.totalorder %s3336_s27, %s4156_s5 }
  0x1c   :  { %p3342_p10 = pnand %p3340_p9, %p3337_p8 }
  0x1e   :  { %3345 = shalt.err (!%p3342_p10)
}
  0x1f   :  { %s3346_s2 = scalar_lea.vmem %s77_s22, 8192  ;;  %p3351_p12 = scmp.lt.s32.totalorder %s77_s22, %s77_s22 }
  0x20   :  { %p3347_p11 = scmp.ne.s32.totalorder %s77_s22, %s3346_s2  ;;  %p3352_p13 = scmp.lt.s32.totalorder %s3346_s2, %s3346_s2 }
  0x22   :  { %p3353_p0 = por %p3352_p13, %p3351_p12 }
  0x24   :  { %p3354_p1 = pnand %p3353_p0, %p3347_p11 }
  0x26   :  { %3357 = shalt.err (!%p3354_p1)
}
  0x27   :  { %82 = dma.hbm_to_vmem [thread:$0]  %s4156_s5, 8192, %s77_s22, [#allocation15], %s3431_s17, %s3431_s17, %s3432_s18  }
  0x28   :  { %s3358_s19 = scalar_lea.hbm %s4151_s0, 256 }
  0x29   :  { %p3359_p2 = scmp.ne.s32.totalorder %s4151_s0, %s3358_s19  ;;  %p3362_p3 = scmp.lt.u32.totalorder %s3358_s19, %s4151_s0 }
  0x2b   :  { %p3364_p4 = pnand %p3362_p3, %p3359_p2 }
  0x2d   :  { %3367 = shalt.err (!%p3364_p4)
}
  0x2e   :  { %s3368_s10 = scalar_lea.vmem %s37_s24, 256  ;;  %p3373_p6 = scmp.lt.s32.totalorder %s37_s24, %s37_s24 }
  0x2f   :  { %p3369_p5 = scmp.ne.s32.totalorder %s37_s24, %s3368_s10  ;;  %p3374_p7 = scmp.lt.s32.totalorder %s3368_s10, %s3368_s10 }
  0x31   :  { %p3375_p8 = por %p3374_p7, %p3373_p6 }
  0x33   :  { %p3376_p9 = pnand %p3375_p8, %p3369_p5 }
  0x35   :  { %3379 = shalt.err (!%p3376_p9)
}
  0x36   :  { %s3435_s5 = smov 2   ;;  %s3436_s12 = smov [#allocation13]  }
  0x37   :  { %42 = dma.hbm_to_vmem [thread:$0]  %s4151_s0, 256, %s37_s24, [#allocation10], %s3432_s18, %s3432_s18, %s3435_s5  }
  0x38   :  { %s62_s28 = sshll.u32 %s3436_s12, 4  ;;  %s3437_s29 = smov [#allocation16]   ;;  %s63_s28 = int_to_ptr.vmem [resolvable:$true] %s62_s28 }
  0x39   :  { %s90_s13 = sshll.u32 %s3437_s29, 4  ;;  %s3380_s30 = scalar_lea.hbm %s4154_s3, 8192  ;;  %s3577_s13 = int_to_ptr.vmem [resolvable:$true] %s90_s13 }
  0x3a   :  { %p3381_p10 = scmp.ne.s32.totalorder %s4154_s3, %s3380_s30  ;;  %p3384_p11 = scmp.lt.u32.totalorder %s3380_s30, %s4154_s3 }
  0x3c   :  { %p3386_p12 = pnand %p3384_p11, %p3381_p10 }
  0x3e   :  { %3389 = shalt.err (!%p3386_p12)
}
  0x3f   :  { %s3390_s0 = scalar_lea.vmem %s63_s28, 8192  ;;  %p3395_p0 = scmp.lt.s32.totalorder %s63_s28, %s63_s28 }
  0x40   :  { %p3391_p13 = scmp.ne.s32.totalorder %s63_s28, %s3390_s0  ;;  %p3396_p1 = scmp.lt.s32.totalorder %s3390_s0, %s3390_s0 }
  0x42   :  { %p3397_p2 = por %p3396_p1, %p3395_p0 }
  0x44   :  { %p3398_p3 = pnand %p3397_p2, %p3391_p13 }
  0x46   :  { %3401 = shalt.err (!%p3398_p3)
}
  0x47   :  { %68 = dma.hbm_to_vmem [thread:$0]  %s4154_s3, 8192, %s63_s28, [#allocation12], %s3431_s17, %s3431_s17, %s3432_s18  }
  0x48   :  { %s3402_s10 = scalar_lea.hbm %s4158_s7, 2048 }
  0x49   :  { %p3403_p4 = scmp.ne.s32.totalorder %s4158_s7, %s3402_s10  ;;  %p3406_p5 = scmp.lt.u32.totalorder %s3402_s10, %s4158_s7 }
  0x4b   :  { %p3408_p6 = pnand %p3406_p5, %p3403_p4 }
  0x4d   :  { %3411 = shalt.err (!%p3408_p6)
}
  0x4e   :  { %s3412_s29 = scalar_lea.vmem %s3577_s13, 2048  ;;  %p3417_p8 = scmp.lt.s32.totalorder %s3577_s13, %s3577_s13 }
  0x4f   :  { %p3413_p7 = scmp.ne.s32.totalorder %s3577_s13, %s3412_s29  ;;  %p3418_p9 = scmp.lt.s32.totalorder %s3412_s29, %s3412_s29 }
  0x51   :  { %p3419_p10 = por %p3418_p9, %p3417_p8 }
  0x53   :  { %p3420_p11 = pnand %p3419_p10, %p3413_p7 }
  0x55   :  { %3423 = shalt.err (!%p3420_p11)
}
  0x56   :  { %96 = dma.hbm_to_vmem [thread:$0]  %s4158_s7, 2048, %s3577_s13, [#allocation15], %s3431_s17, %s3431_s17, %s3432_s18  }
  0x57   :  { %3424 = dma.done.wait [#allocation10], 256  }
  0x58   :  { %3425 = vsyncadd [#allocation10], 4294967040 }
  0x59   :  { %3426 = dma.done.wait [#allocation12], 10240  }
  0x5a   :  { %3427 = vsyncadd [#allocation12], 4294957056 }
  0x5b   :  { %3428 = dma.done.wait [#allocation15], 10240  }
  0x5c   :  { %3429 = vsyncadd [#allocation15], 4294957056  ;;  %v4167_v4 = vmov 0.0   ;;  %v158_v5 = vlaneseq  ;;  %v3439_v6 = vmov 1983009808   ;;  %v141_v8 = vld [vmem:[#allocation11 + $0x8] sm:$0xff] }
  0x5d   :  { %289 = vmatprep.mubr.f32.mxu0 %v4167_v4  ;;  %130 = vst [vmem:[#allocation3] sm:$0x3] %v4167_v4  ;;  %131 = vst [vmem:[#allocation4] sm:$0x3] %v4167_v4  ;;  %366 = vmatprep.mubr.f32.mxu1 %v4167_v4  ;;  %v189_v7 = vunpack.c.l.s4 %v3439_v6  ;;  %v145_v9 = vld [vmem:[#allocation11 + $0x28] sm:$0xff]  ;;  %v143_v10 = vld [vmem:[#allocation11 + $0x18] sm:$0xff] }
  0x5e   :  { %v3618_v11 = vshrl.u32 %v158_v5, 7  ;;  %v2612_v13 = vpack.c.bf16 %v145_v9, %v141_v8  ;;  %v147_v14 = vld [vmem:[#allocation11 + $0x38] sm:$0xff]  ;;  %v140_v15 = vld [vmem:[#allocation11] sm:$0xff]  ;;  %v142_v19 = vld [vmem:[#allocation11 + $0x10] sm:$0xff]  ;;  %vm220_vm0 = vcmask 261120   ;;  %vm2576_vm1 = vcmask 1041408  }
  0x5f   :  { %v190_v12 = vunpack.c.0.s8 %v189_v7  ;;  %v144_v16 = vld [vmem:[#allocation11 + $0x20] sm:$0xff]  ;;  %v2620_v17 = vpack.c.bf16 %v147_v14, %v143_v10  ;;  %v146_v20 = vld [vmem:[#allocation11 + $0x30] sm:$0xff]  ;;  %v149_v21 = vld [vmem:[#allocation11 + $0x48] sm:$0xff]  ;;  %vm2597_vm2 = vcmask 1024  }
  0x60   :  { %v2614_v18 = vpack.c.bf16 %v144_v16, %v140_v15  ;;  %2613 = vmatprep.subr.bf16.mxu0 %v2612_v13  ;;  %v2622_v22 = vpack.c.bf16 %v146_v20, %v142_v19  ;;  %v153_v23 = vld [vmem:[#allocation11 + $0x68] sm:$0xff]  ;;  %v151_v24 = vld [vmem:[#allocation11 + $0x58] sm:$0xff]  ;;  %v148_v28 = vld [vmem:[#allocation11 + $0x40] sm:$0xff] }
  0x61   :  { %v155_v25 = vld [vmem:[#allocation11 + $0x78] sm:$0xff]  ;;  %2621 = vmatprep.subr.bf16.mxu1 %v2620_v17  ;;  %v2616_v26 = vpack.c.bf16 %v153_v23, %v149_v21  ;;  %v152_v29 = vld [vmem:[#allocation11 + $0x60] sm:$0xff]  ;;  %v150_v30 = vld [vmem:[#allocation11 + $0x50] sm:$0xff]  ;;  %v3621_v31 = vsub.s32 %v190_v12, %v3618_v11 }
  0x62   :  { %2615 = vmatpush1.bf16.msra.mxu0 %v2614_v18  ;;  %v2624_v27 = vpack.c.bf16 %v155_v25, %v151_v24  ;;  %2623 = vmatpush1.bf16.msra.mxu1 %v2622_v22  ;;  %v2618_v32 = vpack.c.bf16 %v152_v29, %v148_v28  ;;  %v154_v33 = vld [vmem:[#allocation11 + $0x70] sm:$0xff]  ;;  %v479_v40 = vld [vmem:[#allocation13 + $0x8] sm:$0xff]  ;;  %v481_v43 = vld [vmem:[#allocation13 + $0x18] sm:$0xff] }
  0x63   :  { %v132_v34 = vld [vmem:[#allocation9] sm:$0x3]  ;;  %v133_v35 = vld [vmem:[#allocation9 + $0x2] sm:$0x3]  ;;  %2617 = vmatprep.subr.bf16.mxu0 %v2616_v26  ;;  %v2626_v36 = vpack.c.bf16 %v154_v33, %v150_v30  ;;  %v134_v37 = vld [vmem:[#allocation9 + $0x4] sm:$0x3] }
  0x64   :  { %2625 = vmatprep.subr.bf16.mxu1 %v2624_v27  ;;  %v135_v38 = vld [vmem:[#allocation9 + $0x6] sm:$0x3]  ;;  %v186_v39 = vcombine.low %v132_v34, %v133_v35  ;;  %v483_v42 = vld [vmem:[#allocation13 + $0x28] sm:$0xff]  ;;  %v485_v44 = vld [vmem:[#allocation13 + $0x38] sm:$0xff] }
  0x65   :  { %v187_v41 = vcombine.low %v134_v37, %v135_v38  ;;  %v3624_v46 = vpack.c.bf16 %v483_v42, %v479_v40  ;;  %v3626_v47 = vpack.c.bf16 %v485_v44, %v481_v43  ;;  %v478_v48 = vld [vmem:[#allocation13] sm:$0xff]  ;;  %v480_v50 = vld [vmem:[#allocation13 + $0x10] sm:$0xff]  ;;  %v487_v53 = vld [vmem:[#allocation13 + $0x48] sm:$0xff] }
  0x66   :  { %2619 = vmatpush1.bf16.msra.mxu0 %v2618_v32  ;;  %v194_v45 = vrot.slane %v186_v39, %v3621_v31  ;;  %v482_v49 = vld [vmem:[#allocation13 + $0x20] sm:$0xff]  ;;  %2627 = vmatpush1.bf16.msra.mxu1 %v2626_v36  ;;  %v484_v52 = vld [vmem:[#allocation13 + $0x30] sm:$0xff]  ;;  %v491_v54 = vld [vmem:[#allocation13 + $0x68] sm:$0xff] }
  0x67   :  { %v201_v51 = vrot.slane %v187_v41, %v3621_v31  ;;  %2629 = vmatprep.subr.bf16.mxu0 %v3624_v46  ;;  %2661 = vmatprep.subr.bf16.mxu1 %v3626_v47  ;;  %v3631_v55 = vpack.c.bf16 %v482_v49, %v478_v48  ;;  %v3633_v56 = vpack.c.bf16 %v484_v52, %v480_v50  ;;  %v489_v57 = vld [vmem:[#allocation13 + $0x58] sm:$0xff]  ;;  %v486_v59 = vld [vmem:[#allocation13 + $0x40] sm:$0xff]  ;;  %v488_v0 = vld [vmem:[#allocation13 + $0x50] sm:$0xff] }
  0x68   :  { %v493_v58 = vld [vmem:[#allocation13 + $0x78] sm:$0xff]  ;;  %v3635_v61 = vpack.c.bf16 %v491_v54, %v487_v53  ;;  %v490_v63 = vld [vmem:[#allocation13 + $0x60] sm:$0xff]  ;;  %v492_v1 = vld [vmem:[#allocation13 + $0x70] sm:$0xff] }
  0x69   :  { %v202_v60 = vcombine.low %v194_v45, %v201_v51  ;;  %v3637_v62 = vpack.c.bf16 %v493_v58, %v489_v57  ;;  %v495_v2 = vld [vmem:[#allocation13 + $0x88] sm:$0xff]  ;;  %v497_v5 = vld [vmem:[#allocation13 + $0x98] sm:$0xff]  ;;  %v3643_v7 = vpack.c.bf16 %v490_v63, %v486_v59  ;;  %v3645_v8 = vpack.c.bf16 %v492_v1, %v488_v0  ;;  %v494_v9 = vld [vmem:[#allocation13 + $0x80] sm:$0xff] }
  0x6a   :  { %v499_v3 = vld [vmem:[#allocation13 + $0xa8] sm:$0xff]  ;;  %v501_v6 = vld [vmem:[#allocation13 + $0xb8] sm:$0xff]  ;;  %v498_v10 = vld [vmem:[#allocation13 + $0xa0] sm:$0xff] }
  0x6b   :  { %2606 = vmatmul.mubr.msk.f32.vlgmr.msra.gmra.mrb[0].mxu0 %vm220_vm0, %v202_v60  ;;  %2608 = vmatmul.mubr.msk.f32.vlgmr.msra.gmra.mrb[0].mxu1 %vm220_vm0, %v202_v60  ;;  %v3649_v12 = vpack.c.bf16 %v499_v3, %v495_v2  ;;  %v3651_v13 = vpack.c.bf16 %v501_v6, %v497_v5  ;;  %v496_v14 = vld [vmem:[#allocation13 + $0x90] sm:$0xff]  ;;  %v503_v16 = vld [vmem:[#allocation13 + $0xc8] sm:$0xff]  ;;  %v505_v18 = vld [vmem:[#allocation13 + $0xd8] sm:$0xff]  ;;  %v3657_v20 = vpack.c.bf16 %v498_v10, %v494_v9 }
  0x6c   :  { %2631 = vmatpush1.bf16.msra.mxu0 %v3631_v55  ;;  %2663 = vmatpush1.bf16.msra.mxu1 %v3633_v56  ;;  %v500_v15 = vld [vmem:[#allocation13 + $0xb0] sm:$0xff]  ;;  %v507_v17 = vld [vmem:[#allocation13 + $0xe8] sm:$0xff]  ;;  %v509_v19 = vld [vmem:[#allocation13 + $0xf8] sm:$0xff] }
  0x6d   :  { %2633 = vmatprep.subr.bf16.mxu0 %v3635_v61  ;;  %2665 = vmatprep.subr.bf16.mxu1 %v3637_v62  ;;  %v3659_v21 = vpack.c.bf16 %v500_v15, %v496_v14  ;;  %v502_v22 = vld [vmem:[#allocation13 + $0xc0] sm:$0xff]  ;;  %v3663_v24 = vpack.c.bf16 %v507_v17, %v503_v16  ;;  %v3665_v25 = vpack.c.bf16 %v509_v19, %v505_v18  ;;  %v504_v26 = vld [vmem:[#allocation13 + $0xd0] sm:$0xff]  ;;  %v511_v28 = vld [vmem:[#allocation13 + $0x108] sm:$0xff] }
  0x6e   :  { %295 = vmatprep.mubr.f32.mxu0 %v4167_v4  ;;  %372 = vmatprep.mubr.f32.mxu1 %v4167_v4  ;;  %v506_v23 = vld [vmem:[#allocation13 + $0xe0] sm:$0xff]  ;;  %v508_v27 = vld [vmem:[#allocation13 + $0xf0] sm:$0xff]  ;;  %v515_v29 = vld [vmem:[#allocation13 + $0x128] sm:$0xff] }
  0x6f   :  { %v513_v30 = vld [vmem:[#allocation13 + $0x118] sm:$0xff]  ;;  %v3669_v33 = vpack.c.bf16 %v506_v23, %v502_v22  ;;  %v3671_v34 = vpack.c.bf16 %v508_v27, %v504_v26  ;;  %v510_v35 = vld [vmem:[#allocation13 + $0x100] sm:$0xff]  ;;  %v3675_v37 = vpack.c.bf16 %v515_v29, %v511_v28  ;;  %v512_v39 = vld [vmem:[#allocation13 + $0x110] sm:$0xff] }
  0x70   :  { %2635 = vmatpush1.bf16.msra.mxu0 %v3643_v7  ;;  %2667 = vmatpush1.bf16.msra.mxu1 %v3645_v8  ;;  %v517_v32 = vld [vmem:[#allocation13 + $0x138] sm:$0xff]  ;;  %v514_v36 = vld [vmem:[#allocation13 + $0x120] sm:$0xff]  ;;  %v516_v40 = vld [vmem:[#allocation13 + $0x130] sm:$0xff] }
  0x71   :  { %2637 = vmatprep.subr.bf16.mxu0 %v3649_v12  ;;  %2669 = vmatprep.subr.bf16.mxu1 %v3651_v13  ;;  %v3677_v38 = vpack.c.bf16 %v517_v32, %v513_v30  ;;  %v519_v41 = vld [vmem:[#allocation13 + $0x148] sm:$0xff]  ;;  %v521_v43 = vld [vmem:[#allocation13 + $0x158] sm:$0xff]  ;;  %v518_v45 = vld [vmem:[#allocation13 + $0x140] sm:$0xff]  ;;  %v3681_v50 = vpack.c.bf16 %v514_v36, %v510_v35  ;;  %v3683_v51 = vpack.c.bf16 %v516_v40, %v512_v39 }
  0x72   :  { %v523_v42 = vld [vmem:[#allocation13 + $0x168] sm:$0xff]  ;;  %v525_v44 = vld [vmem:[#allocation13 + $0x178] sm:$0xff]  ;;  %v522_v52 = vld [vmem:[#allocation13 + $0x160] sm:$0xff] }
  0x73   :  { %v136_v48 = vld [vmem:[#allocation9 + $0x8] sm:$0x3]  ;;  %v137_v49 = vld [vmem:[#allocation9 + $0xa] sm:$0x3]  ;;  %v138_v53 = vld [vmem:[#allocation9 + $0xc] sm:$0x3]  ;;  %v3687_v58 = vpack.c.bf16 %v523_v42, %v519_v41  ;;  %v3689_v59 = vpack.c.bf16 %v525_v44, %v521_v43  ;;  %v3695_v10 = vpack.c.bf16 %v522_v52, %v518_v45 }
  0x74   :  { %2639 = vmatpush1.bf16.msra.mxu0 %v3657_v20  ;;  %2671 = vmatpush1.bf16.msra.mxu1 %v3659_v21  ;;  %v139_v54 = vld [vmem:[#allocation9 + $0xe] sm:$0x3]  ;;  %v203_v57 = vcombine.low %v136_v48, %v137_v49  ;;  %v520_v60 = vld [vmem:[#allocation13 + $0x150] sm:$0xff]  ;;  %v527_v0 = vld [vmem:[#allocation13 + $0x188] sm:$0xff]  ;;  %v3768_v48 = vsub.s32 0, %v3618_v11  ;;  %v3771_v49 = vsub.s32 2, %v3618_v11 }
  0x75   :  { %2641 = vmatprep.subr.bf16.mxu0 %v3663_v24  ;;  %2673 = vmatprep.subr.bf16.mxu1 %v3665_v25  ;;  %v524_v63 = vld [vmem:[#allocation13 + $0x170] sm:$0xff]  ;;  %v204_v1 = vcombine.low %v138_v53, %v139_v54  ;;  %v531_v2 = vld [vmem:[#allocation13 + $0x1a8] sm:$0xff]  ;;  %v529_v3 = vld [vmem:[#allocation13 + $0x198] sm:$0xff]  ;;  %v3777_v53 = vsub.s32 1, %v3618_v11  ;;  %v3780_v54 = vsub.s32 3, %v3618_v11 }
  0x76   :  { %v533_v5 = vld [vmem:[#allocation13 + $0x1b8] sm:$0xff]  ;;  %v211_v6 = vrot.slane %v203_v57, %v3621_v31  ;;  %v3697_v14 = vpack.c.bf16 %v524_v63, %v520_v60  ;;  %v526_v15 = vld [vmem:[#allocation13 + $0x180] sm:$0xff]  ;;  %v3701_v17 = vpack.c.bf16 %v531_v2, %v527_v0  ;;  %v528_v19 = vld [vmem:[#allocation13 + $0x190] sm:$0xff] }
  0x77   :  { %v218_v9 = vrot.slane %v204_v1, %v3621_v31  ;;  %v530_v16 = vld [vmem:[#allocation13 + $0x1a0] sm:$0xff]  ;;  %v3703_v18 = vpack.c.bf16 %v533_v5, %v529_v3  ;;  %v532_v22 = vld [vmem:[#allocation13 + $0x1b0] sm:$0xff]  ;;  %v535_v26 = vld [vmem:[#allocation13 + $0x1c8] sm:$0xff]  ;;  %4171 = vst [vmem:[#allocation20_spill] sm:$0xff] %v3780_v54 }
  0x78   :  { %2643 = vmatpush1.bf16.msra.mxu0 %v3669_v33  ;;  %2675 = vmatpush1.bf16.msra.mxu1 %v3671_v34  ;;  %v539_v27 = vld [vmem:[#allocation13 + $0x1e8] sm:$0xff]  ;;  %v537_v28 = vld [vmem:[#allocation13 + $0x1d8] sm:$0xff]  ;;  %v3709_v30 = vpack.c.bf16 %v530_v16, %v526_v15  ;;  %v3711_v32 = vpack.c.bf16 %v532_v22, %v528_v19  ;;  %v534_v35 = vld [vmem:[#allocation13 + $0x1c0] sm:$0xff] }
  0x79   :  { %2645 = vmatprep.subr.bf16.mxu0 %v3675_v37  ;;  %2677 = vmatprep.subr.bf16.mxu1 %v3677_v38  ;;  %v219_v23 = vcombine.low %v211_v6, %v218_v9  ;;  %v541_v29 = vld [vmem:[#allocation13 + $0x1f8] sm:$0xff]  ;;  %v3715_v36 = vpack.c.bf16 %v539_v27, %v535_v26  ;;  %v538_v40 = vld [vmem:[#allocation13 + $0x1e0] sm:$0xff]  ;;  %v536_v41 = vld [vmem:[#allocation13 + $0x1d0] sm:$0xff] }
  0x7a   :  { %v3717_v39 = vpack.c.bf16 %v541_v29, %v537_v28  ;;  %v540_v42 = vld [vmem:[#allocation13 + $0x1f0] sm:$0xff]  ;;  %v3723_v43 = vpack.c.bf16 %v538_v40, %v534_v35  ;;  %v475_v45 = vld [vmem:[#allocation3] sm:$0x3] }
  0x7b   :  { %2607 = vmatmul.mubr.msk.f32.gmra.mrb[2].mxu0 %vm220_vm0, %v219_v23  ;;  %2609 = vmatmul.mubr.msk.f32.gmra.mrb[2].mxu1 %vm220_vm0, %v219_v23  ;;  %v3725_v44 = vpack.c.bf16 %v540_v42, %v536_v41  ;;  %v156_v52 = vld [vmem:[%s4155_s4] sm:$0xf] }
  0x7c   :  { %2647 = vmatpush1.bf16.msra.mxu0 %v3681_v50  ;;  %2679 = vmatpush1.bf16.msra.mxu1 %v3683_v51  ;;  %v161_v57 = vrot.slane %v156_v52, %v3768_v48  ;;  %v169_v60 = vrot.slane %v156_v52, %v3771_v49  ;;  %v165_v63 = vrot.slane %v156_v52, %v3777_v53 }
  0x7d   :  { %2649 = vmatprep.subr.bf16.mxu0 %v3687_v58  ;;  %2681 = vmatprep.subr.bf16.mxu1 %v3689_v59  ;;  %v173_v0 = vrot.slane %v156_v52, %v3780_v54 }
  0x7e   :  { %606 = vmatprep.mubr.f32.mxu0 %v4167_v4  ;;  %677 = vmatprep.mubr.f32.mxu1 %v4167_v4 }
  0x80   :  { %2651 = vmatpush1.bf16.msra.mxu0 %v3695_v10  ;;  %2683 = vmatpush1.bf16.msra.mxu1 %v3697_v14 }
  0x81   :  { %2653 = vmatprep.subr.bf16.mxu0 %v3701_v17  ;;  %2685 = vmatprep.subr.bf16.mxu1 %v3703_v18 }
  0x84   :  { %2655 = vmatpush1.bf16.msra.mxu0 %v3709_v30  ;;  %2687 = vmatpush1.bf16.msra.mxu1 %v3711_v32 }
  0x85   :  { %2657 = vmatprep.subr.bf16.mxu0 %v3715_v36  ;;  %2689 = vmatprep.subr.bf16.mxu1 %v3717_v39 }
  0x88   :  { %2659 = vmatpush1.bf16.msra.mxu0 %v3723_v43  ;;  %2691 = vmatpush1.bf16.msra.mxu1 %v3725_v44 }
  0x89   :  { %2693 = vmatprep.subr.bf16.mxu0 %v3624_v46  ;;  %2725 = vmatprep.subr.bf16.mxu1 %v3626_v47 }
  0x8b   :  { %607 = vmatmul.mubr.f32.vlgmr.msra.gmra.mrb[4].mxu0 %v475_v45  ;;  %678 = vmatmul.mubr.f32.vlgmr.msra.gmra.mrb[4].mxu1 %v475_v45 }
  0x8c   :  { %2695 = vmatpush1.bf16.msra.mxu0 %v3631_v55  ;;  %2727 = vmatpush1.bf16.msra.mxu1 %v3633_v56 }
  0x8d   :  { %2697 = vmatprep.subr.bf16.mxu0 %v3635_v61  ;;  %2729 = vmatprep.subr.bf16.mxu1 %v3637_v62 }
  0x8e   :  { %798 = vmatprep.mubr.f32.mxu0 %v4167_v4  ;;  %869 = vmatprep.mubr.f32.mxu1 %v4167_v4 }
  0x90   :  { %2699 = vmatpush1.bf16.msra.mxu0 %v3643_v7  ;;  %2731 = vmatpush1.bf16.msra.mxu1 %v3645_v8 }
  0x91   :  { %2701 = vmatprep.subr.bf16.mxu0 %v3649_v12  ;;  %2733 = vmatprep.subr.bf16.mxu1 %v3651_v13 }
  0x94   :  { %2703 = vmatpush1.bf16.msra.mxu0 %v3657_v20  ;;  %2735 = vmatpush1.bf16.msra.mxu1 %v3659_v21 }
  0x95   :  { %2705 = vmatprep.subr.bf16.mxu0 %v3663_v24  ;;  %2737 = vmatprep.subr.bf16.mxu1 %v3665_v25 }
  0x98   :  { %2707 = vmatpush1.bf16.msra.mxu0 %v3669_v33  ;;  %2739 = vmatpush1.bf16.msra.mxu1 %v3671_v34 }
  0x99   :  { %2709 = vmatprep.subr.bf16.mxu0 %v3675_v37  ;;  %2741 = vmatprep.subr.bf16.mxu1 %v3677_v38 }
  0x9c   :  { %2711 = vmatpush1.bf16.msra.mxu0 %v3681_v50  ;;  %2743 = vmatpush1.bf16.msra.mxu1 %v3683_v51 }
  0x9d   :  { %2713 = vmatprep.subr.bf16.mxu0 %v3687_v58  ;;  %2745 = vmatprep.subr.bf16.mxu1 %v3689_v59 }
  0xa0   :  { %2715 = vmatpush1.bf16.msra.mxu0 %v3695_v10  ;;  %2747 = vmatpush1.bf16.msra.mxu1 %v3697_v14 }
  0xa1   :  { %2717 = vmatprep.subr.bf16.mxu0 %v3701_v17  ;;  %2749 = vmatprep.subr.bf16.mxu1 %v3703_v18 }
  0xa4   :  { %2719 = vmatpush1.bf16.msra.mxu0 %v3709_v30  ;;  %2751 = vmatpush1.bf16.msra.mxu1 %v3711_v32 }
  0xa5   :  { %2721 = vmatprep.subr.bf16.mxu0 %v3715_v36  ;;  %2753 = vmatprep.subr.bf16.mxu1 %v3717_v39 }
  0xa8   :  { %2723 = vmatpush1.bf16.msra.mxu0 %v3723_v43  ;;  %2755 = vmatpush1.bf16.msra.mxu1 %v3725_v44 }
  0xa9   :  { %2757 = vmatprep.subr.bf16.mxu0 %v3624_v46  ;;  %2789 = vmatprep.subr.bf16.mxu1 %v3626_v47 }
 0x13e   :  { %v291_v1 = vpop.f32.mrb[0].mxu0  ;;  %v368_v2 = vpop.f32.mrb[0].mxu1 }
 0x13f   :  { %v292_v3 = vadd.f32 %v291_v1, %v161_v57  ;;  %v369_v5 = vadd.f32 %v368_v2, %v169_v60  ;;  %v293_v6 = vpop.f32.mrb[1].mxu0  ;;  %v370_v9 = vpop.f32.mrb[1].mxu1 }
 0x140   :  { %v294_v15 = vadd.f32 %v293_v6, %v165_v63  ;;  %v371_v16 = vadd.f32 %v370_v9, %v173_v0 }
 0x142   :  { %v387_v19 = vcombine.low %v292_v3, %v294_v15  ;;  %v388_v22 = vcombine.high %v292_v3, %v294_v15  ;;  %v389_v11 = vcombine.low %v369_v5, %v371_v16  ;;  %v390_v23 = vcombine.high %v369_v5, %v371_v16 }
 0x144   :  { %v3787_v26 = vrot.slane %v387_v19, %v3621_v31  ;;  %v3790_v27 = vrot.slane %v388_v22, %v3621_v31  ;;  %v3793_v28 = vrot.slane %v389_v11, %v3621_v31  ;;  %v3796_v29 = vrot.slane %v390_v23, %v3621_v31 }
 0x146   :  { %v419_v35 = vcombine.low %v3787_v26, %v3793_v28 }
 0x14e   :  { %v297_v45 = vpop.f32.mrb[2].mxu0  ;;  %v374_v52 = vpop.f32.mrb[2].mxu1 }
 0x14f   :  { %v298_v1 = vadd.f32 %v297_v45, %v161_v57  ;;  %v375_v2 = vadd.f32 %v374_v52, %v169_v60  ;;  %v299_v3 = vpop.f32.mrb[3].mxu0  ;;  %v376_v5 = vpop.f32.mrb[3].mxu1 }
 0x150   :  { %v300_v6 = vadd.f32 %v299_v3, %v165_v63  ;;  %v377_v9 = vadd.f32 %v376_v5, %v173_v0 }
 0x152   :  { %v423_v15 = vcombine.low %v298_v1, %v300_v6  ;;  %v424_v16 = vcombine.high %v298_v1, %v300_v6  ;;  %v425_v19 = vcombine.low %v375_v2, %v377_v9  ;;  %v426_v22 = vcombine.high %v375_v2, %v377_v9 }
 0x154   :  { %v3807_v11 = vrot.slane %v423_v15, %v3621_v31  ;;  %v3810_v23 = vrot.slane %v424_v16, %v3621_v31  ;;  %v3813_v42 = vrot.slane %v425_v19, %v3621_v31  ;;  %v3816_v57 = vrot.slane %v426_v22, %v3621_v31 }
 0x15e   :  { %v608_v52 = vpop.f32.mrb[4].mxu0  ;;  %v679_v1 = vpop.f32.mrb[4].mxu1 }
 0x15f   :  { %v610_v2 = vpop.f32.mrb[5].mxu0  ;;  %v681_v3 = vpop.f32.mrb[5].mxu1 }
 0x160   :  { %v688_v5 = vcombine.low %v608_v52, %v610_v2  ;;  %v689_v6 = vcombine.low %v679_v1, %v681_v3  ;;  %v476_v2 = vld [vmem:[#allocation4] sm:$0x3] }
 0x162   :  { %v696_v9 = vrot.slane %v688_v5, %v3621_v31  ;;  %v703_v15 = vrot.slane %v689_v6, %v3621_v31 }
 0x164   :  { %v704_v16 = vcombine.low %v696_v9, %v703_v15 }
 0x166   :  { %v706_v19 = vadd.f32 %v704_v16, %v419_v35 }
 0x168   :  { %v707_v22 = vmul.f32 0.5, %v706_v19  ;;  %v712_v63 = vrot.slane %v706_v19, 2  ;;  %v718_v0 = vrot.slane %v706_v19, 4  ;;  %v721_v41 = vrot.slane %v706_v19, 6 }
 0x16a   :  { %3232 = vtanh.f32 %v707_v22  ;;  %v714_v60 = vmul.f32 0.5, %v712_v63  ;;  %v723_v45 = vmul.f32 0.5, %v721_v41 }
 0x16c   :  { %3234 = vtanh.f32 %v714_v60 }
 0x16d   :  { %3236 = vtanh.f32 %v718_v0 }
 0x16e   :  { %3238 = vtanh.f32 %v723_v45 }
 0x174   :  { %v3233_v40 = vpop.eup %3232 }
 0x175   :  { %v709_v4 = vmul.f32 0.5, %v3233_v40 }
 0x176   :  { %v3235_v54 = vpop.eup %3234 }
 0x177   :  { %v710_v52 = vadd.f32 0.5, %v709_v4  ;;  %v716_v1 = vmul.f32 0.5, %v3235_v54  ;;  %v3237_v5 = vpop.eup %3236  ;;  %v4172_v4 = vmov 0.0  }
 0x178   :  { %v3239_v60 = vpop.eup %3238 }
 0x179   :  { %v717_v3 = vadd.f32 0.5, %v716_v1  ;;  %v728_v35 = vmul.f32 %v3237_v5, %v710_v52  ;;  %v725_v63 = vmul.f32 0.5, %v3239_v60 }
 0x17b   :  { %v727_v6 = vmul.f32 %v717_v3, %v476_v2  ;;  %v726_v15 = vadd.f32 0.5, %v725_v63  ;;  %v4173_v3 = vcombine.high %v3787_v26, %v3793_v28 }
 0x17d   :  { %v3828_v9 = vadd.f32 %v728_v35, %v727_v6 }
 0x17f   :  { %3240 = vtanh.f32 %v3828_v9 }
 0x189   :  { %v3241_v0 = vpop.eup %3240 }
 0x18a   :  { %v731_v41 = vmul.f32 %v3241_v0, %v726_v15 }
 0x18c   :  { %799 = vmatmul.mubr.f32.vlgmr.msra.gmra.mrb[6].mxu0 %v731_v41  ;;  %870 = vmatmul.mubr.f32.vlgmr.msra.gmra.mrb[6].mxu1 %v731_v41 }
 0x18d   :  { %2759 = vmatpush1.bf16.msra.mxu0 %v3631_v55  ;;  %2791 = vmatpush1.bf16.msra.mxu1 %v3633_v56 }
 0x18e   :  { %2761 = vmatprep.subr.bf16.mxu0 %v3635_v61  ;;  %2793 = vmatprep.subr.bf16.mxu1 %v3637_v62 }
 0x18f   :  { %990 = vmatprep.mubr.f32.mxu0 %v4172_v4  ;;  %1061 = vmatprep.mubr.f32.mxu1 %v4172_v4 }
 0x191   :  { %2763 = vmatpush1.bf16.msra.mxu0 %v3643_v7  ;;  %2795 = vmatpush1.bf16.msra.mxu1 %v3645_v8 }
 0x192   :  { %2765 = vmatprep.subr.bf16.mxu0 %v3649_v12  ;;  %2797 = vmatprep.subr.bf16.mxu1 %v3651_v13 }
 0x195   :  { %2767 = vmatpush1.bf16.msra.mxu0 %v3657_v20  ;;  %2799 = vmatpush1.bf16.msra.mxu1 %v3659_v21 }
 0x196   :  { %2769 = vmatprep.subr.bf16.mxu0 %v3663_v24  ;;  %2801 = vmatprep.subr.bf16.mxu1 %v3665_v25 }
 0x199   :  { %2771 = vmatpush1.bf16.msra.mxu0 %v3669_v33  ;;  %2803 = vmatpush1.bf16.msra.mxu1 %v3671_v34 }
 0x19a   :  { %2773 = vmatprep.subr.bf16.mxu0 %v3675_v37  ;;  %2805 = vmatprep.subr.bf16.mxu1 %v3677_v38 }
 0x19d   :  { %2775 = vmatpush1.bf16.msra.mxu0 %v3681_v50  ;;  %2807 = vmatpush1.bf16.msra.mxu1 %v3683_v51 }
 0x19e   :  { %2777 = vmatprep.subr.bf16.mxu0 %v3687_v58  ;;  %2809 = vmatprep.subr.bf16.mxu1 %v3689_v59 }
 0x1a1   :  { %2779 = vmatpush1.bf16.msra.mxu0 %v3695_v10  ;;  %2811 = vmatpush1.bf16.msra.mxu1 %v3697_v14 }
 0x1a2   :  { %2781 = vmatprep.subr.bf16.mxu0 %v3701_v17  ;;  %2813 = vmatprep.subr.bf16.mxu1 %v3703_v18 }
 0x1a5   :  { %2783 = vmatpush1.bf16.msra.mxu0 %v3709_v30  ;;  %2815 = vmatpush1.bf16.msra.mxu1 %v3711_v32 }
 0x1a6   :  { %2785 = vmatprep.subr.bf16.mxu0 %v3715_v36  ;;  %2817 = vmatprep.subr.bf16.mxu1 %v3717_v39 }
 0x1a9   :  { %2787 = vmatpush1.bf16.msra.mxu0 %v3723_v43  ;;  %2819 = vmatpush1.bf16.msra.mxu1 %v3725_v44 }
 0x1aa   :  { %2821 = vmatprep.subr.bf16.mxu0 %v3624_v46  ;;  %2853 = vmatprep.subr.bf16.mxu1 %v3626_v47 }
 0x25f   :  { %v800_v54 = vpop.f32.mrb[6].mxu0  ;;  %v871_v40 = vpop.f32.mrb[6].mxu1 }
 0x260   :  { %v802_v45 = vpop.f32.mrb[7].mxu0  ;;  %v873_v16 = vpop.f32.mrb[7].mxu1 }
 0x261   :  { %v880_v19 = vcombine.low %v800_v54, %v802_v45  ;;  %v881_v22 = vcombine.low %v871_v40, %v873_v16 }
 0x263   :  { %v888_v52 = vrot.slane %v880_v19, %v3621_v31  ;;  %v895_v1 = vrot.slane %v881_v22, %v3621_v31 }
 0x265   :  { %v896_v2 = vcombine.low %v888_v52, %v895_v1 }
 0x267   :  { %v898_v5 = vadd.f32 %v896_v2, %v4173_v3 }
 0x269   :  { %v899_v6 = vmul.f32 0.5, %v898_v5  ;;  %v904_v35 = vrot.slane %v898_v5, 2  ;;  %v910_v63 = vrot.slane %v898_v5, 4  ;;  %v913_v15 = vrot.slane %v898_v5, 6 }
 0x26b   :  { %3242 = vtanh.f32 %v899_v6  ;;  %v906_v60 = vmul.f32 0.5, %v904_v35  ;;  %v915_v0 = vmul.f32 0.5, %v913_v15 }
 0x26d   :  { %3244 = vtanh.f32 %v906_v60 }
 0x26e   :  { %3246 = vtanh.f32 %v910_v63 }
 0x26f   :  { %3248 = vtanh.f32 %v915_v0 }
 0x275   :  { %v3243_v41 = vpop.eup %3242 }
 0x276   :  { %v901_v54 = vmul.f32 0.5, %v3243_v41 }
 0x277   :  { %v3245_v40 = vpop.eup %3244 }
 0x278   :  { %v902_v45 = vadd.f32 0.5, %v901_v54  ;;  %v908_v16 = vmul.f32 0.5, %v3245_v40  ;;  %v3247_v22 = vpop.eup %3246 }
 0x279   :  { %v3249_v1 = vpop.eup %3248 }
 0x27a   :  { %v909_v19 = vadd.f32 0.5, %v908_v16  ;;  %v920_v28 = vmul.f32 %v3247_v22, %v902_v45  ;;  %v917_v2 = vmul.f32 0.5, %v3249_v1  ;;  %v4174_v45 = vcombine.low %v3790_v27, %v3796_v29 }
 0x27c   :  { %v919_v26 = vmul.f32 %v909_v19, %v3828_v9  ;;  %v918_v3 = vadd.f32 0.5, %v917_v2 }
 0x27e   :  { %v3871_v52 = vadd.f32 %v920_v28, %v919_v26 }
 0x280   :  { %3250 = vtanh.f32 %v3871_v52 }
 0x28a   :  { %v3251_v5 = vpop.eup %3250 }
 0x28b   :  { %v923_v6 = vmul.f32 %v3251_v5, %v918_v3 }
 0x28d   :  { %991 = vmatmul.mubr.f32.vlgmr.msra.gmra.mrb[8].mxu0 %v923_v6  ;;  %1062 = vmatmul.mubr.f32.vlgmr.msra.gmra.mrb[8].mxu1 %v923_v6 }
 0x28e   :  { %2823 = vmatpush1.bf16.msra.mxu0 %v3631_v55  ;;  %2855 = vmatpush1.bf16.msra.mxu1 %v3633_v56 }
 0x28f   :  { %2825 = vmatprep.subr.bf16.mxu0 %v3635_v61  ;;  %2857 = vmatprep.subr.bf16.mxu1 %v3637_v62 }
 0x290   :  { %1182 = vmatprep.mubr.f32.mxu0 %v4172_v4  ;;  %1253 = vmatprep.mubr.f32.mxu1 %v4172_v4 }
 0x292   :  { %2827 = vmatpush1.bf16.msra.mxu0 %v3643_v7  ;;  %2859 = vmatpush1.bf16.msra.mxu1 %v3645_v8 }
 0x293   :  { %2829 = vmatprep.subr.bf16.mxu0 %v3649_v12  ;;  %2861 = vmatprep.subr.bf16.mxu1 %v3651_v13 }
 0x296   :  { %2831 = vmatpush1.bf16.msra.mxu0 %v3657_v20  ;;  %2863 = vmatpush1.bf16.msra.mxu1 %v3659_v21 }
 0x297   :  { %2833 = vmatprep.subr.bf16.mxu0 %v3663_v24  ;;  %2865 = vmatprep.subr.bf16.mxu1 %v3665_v25 }
 0x29a   :  { %2835 = vmatpush1.bf16.msra.mxu0 %v3669_v33  ;;  %2867 = vmatpush1.bf16.msra.mxu1 %v3671_v34 }
 0x29b   :  { %2837 = vmatprep.subr.bf16.mxu0 %v3675_v37  ;;  %2869 = vmatprep.subr.bf16.mxu1 %v3677_v38 }
 0x29e   :  { %2839 = vmatpush1.bf16.msra.mxu0 %v3681_v50  ;;  %2871 = vmatpush1.bf16.msra.mxu1 %v3683_v51 }
 0x29f   :  { %2841 = vmatprep.subr.bf16.mxu0 %v3687_v58  ;;  %2873 = vmatprep.subr.bf16.mxu1 %v3689_v59 }
 0x2a2   :  { %2843 = vmatpush1.bf16.msra.mxu0 %v3695_v10  ;;  %2875 = vmatpush1.bf16.msra.mxu1 %v3697_v14 }
 0x2a3   :  { %2845 = vmatprep.subr.bf16.mxu0 %v3701_v17  ;;  %2877 = vmatprep.subr.bf16.mxu1 %v3703_v18 }
 0x2a6   :  { %2847 = vmatpush1.bf16.msra.mxu0 %v3709_v30  ;;  %2879 = vmatpush1.bf16.msra.mxu1 %v3711_v32 }
 0x2a7   :  { %2849 = vmatprep.subr.bf16.mxu0 %v3715_v36  ;;  %2881 = vmatprep.subr.bf16.mxu1 %v3717_v39 }
 0x2aa   :  { %2851 = vmatpush1.bf16.msra.mxu0 %v3723_v43  ;;  %2883 = vmatpush1.bf16.msra.mxu1 %v3725_v44 }
 0x2ab   :  { %2885 = vmatprep.subr.bf16.mxu0 %v3624_v46  ;;  %2917 = vmatprep.subr.bf16.mxu1 %v3626_v47 }
 0x360   :  { %v992_v9 = vpop.f32.mrb[8].mxu0  ;;  %v1063_v35 = vpop.f32.mrb[8].mxu1 }
 0x361   :  { %v994_v60 = vpop.f32.mrb[9].mxu0  ;;  %v1065_v63 = vpop.f32.mrb[9].mxu1 }
 0x362   :  { %v1072_v15 = vcombine.low %v992_v9, %v994_v60  ;;  %v1073_v0 = vcombine.low %v1063_v35, %v1065_v63 }
 0x364   :  { %v1080_v41 = vrot.slane %v1072_v15, %v3621_v31  ;;  %v1087_v54 = vrot.slane %v1073_v0, %v3621_v31 }
 0x366   :  { %v1088_v40 = vcombine.low %v1080_v41, %v1087_v54 }
 0x368   :  { %v1090_v16 = vadd.f32 %v1088_v40, %v4174_v45 }
 0x36a   :  { %v1091_v19 = vmul.f32 0.5, %v1090_v16  ;;  %v1096_v22 = vrot.slane %v1090_v16, 2  ;;  %v1102_v28 = vrot.slane %v1090_v16, 4  ;;  %v1105_v1 = vrot.slane %v1090_v16, 6 }
 0x36c   :  { %3252 = vtanh.f32 %v1091_v19  ;;  %v1098_v26 = vmul.f32 0.5, %v1096_v22  ;;  %v1107_v2 = vmul.f32 0.5, %v1105_v1 }
 0x36e   :  { %3254 = vtanh.f32 %v1098_v26 }
 0x36f   :  { %3256 = vtanh.f32 %v1102_v28 }
 0x370   :  { %3258 = vtanh.f32 %v1107_v2 }
 0x376   :  { %v3253_v3 = vpop.eup %3252 }
 0x377   :  { %v1093_v5 = vmul.f32 0.5, %v3253_v3 }
 0x378   :  { %v3255_v6 = vpop.eup %3254 }
 0x379   :  { %v1094_v9 = vadd.f32 0.5, %v1093_v5  ;;  %v1100_v35 = vmul.f32 0.5, %v3255_v6  ;;  %v3257_v63 = vpop.eup %3256 }
 0x37a   :  { %v3259_v54 = vpop.eup %3258 }
 0x37b   :  { %v1101_v60 = vadd.f32 0.5, %v1100_v35  ;;  %v1112_v0 = vmul.f32 %v3257_v63, %v1094_v9  ;;  %v1109_v40 = vmul.f32 0.5, %v3259_v54  ;;  %v4175_v9 = vcombine.high %v3790_v27, %v3796_v29 }
 0x37d   :  { %v1111_v15 = vmul.f32 %v1101_v60, %v3871_v52  ;;  %v1110_v45 = vadd.f32 0.5, %v1109_v40 }
 0x37f   :  { %v3914_v41 = vadd.f32 %v1112_v0, %v1111_v15 }
 0x381   :  { %3260 = vtanh.f32 %v3914_v41 }
 0x38b   :  { %v3261_v16 = vpop.eup %3260 }
 0x38c   :  { %v1115_v19 = vmul.f32 %v3261_v16, %v1110_v45 }
 0x38e   :  { %1183 = vmatmul.mubr.f32.vlgmr.msra.gmra.mrb[10].mxu0 %v1115_v19  ;;  %1254 = vmatmul.mubr.f32.vlgmr.msra.gmra.mrb[10].mxu1 %v1115_v19 }
 0x38f   :  { %2887 = vmatpush1.bf16.msra.mxu0 %v3631_v55  ;;  %2919 = vmatpush1.bf16.msra.mxu1 %v3633_v56 }
 0x390   :  { %2889 = vmatprep.subr.bf16.mxu0 %v3635_v61  ;;  %2921 = vmatprep.subr.bf16.mxu1 %v3637_v62 }
 0x391   :  { %1374 = vmatprep.mubr.f32.mxu0 %v4172_v4  ;;  %1445 = vmatprep.mubr.f32.mxu1 %v4172_v4 }
 0x393   :  { %2891 = vmatpush1.bf16.msra.mxu0 %v3643_v7  ;;  %2923 = vmatpush1.bf16.msra.mxu1 %v3645_v8 }
 0x394   :  { %2893 = vmatprep.subr.bf16.mxu0 %v3649_v12  ;;  %2925 = vmatprep.subr.bf16.mxu1 %v3651_v13 }
 0x397   :  { %2895 = vmatpush1.bf16.msra.mxu0 %v3657_v20  ;;  %2927 = vmatpush1.bf16.msra.mxu1 %v3659_v21 }
 0x398   :  { %2897 = vmatprep.subr.bf16.mxu0 %v3663_v24  ;;  %2929 = vmatprep.subr.bf16.mxu1 %v3665_v25 }
 0x39b   :  { %2899 = vmatpush1.bf16.msra.mxu0 %v3669_v33  ;;  %2931 = vmatpush1.bf16.msra.mxu1 %v3671_v34 }
 0x39c   :  { %2901 = vmatprep.subr.bf16.mxu0 %v3675_v37  ;;  %2933 = vmatprep.subr.bf16.mxu1 %v3677_v38 }
 0x39f   :  { %2903 = vmatpush1.bf16.msra.mxu0 %v3681_v50  ;;  %2935 = vmatpush1.bf16.msra.mxu1 %v3683_v51 }
 0x3a0   :  { %2905 = vmatprep.subr.bf16.mxu0 %v3687_v58  ;;  %2937 = vmatprep.subr.bf16.mxu1 %v3689_v59 }
 0x3a3   :  { %2907 = vmatpush1.bf16.msra.mxu0 %v3695_v10  ;;  %2939 = vmatpush1.bf16.msra.mxu1 %v3697_v14 }
 0x3a4   :  { %2909 = vmatprep.subr.bf16.mxu0 %v3701_v17  ;;  %2941 = vmatprep.subr.bf16.mxu1 %v3703_v18 }
 0x3a7   :  { %2911 = vmatpush1.bf16.msra.mxu0 %v3709_v30  ;;  %2943 = vmatpush1.bf16.msra.mxu1 %v3711_v32 }
 0x3a8   :  { %2913 = vmatprep.subr.bf16.mxu0 %v3715_v36  ;;  %2945 = vmatprep.subr.bf16.mxu1 %v3717_v39 }
 0x3ab   :  { %2915 = vmatpush1.bf16.msra.mxu0 %v3723_v43  ;;  %2947 = vmatpush1.bf16.msra.mxu1 %v3725_v44 }
 0x3ac   :  { %2949 = vmatprep.subr.bf16.mxu0 %v3624_v46  ;;  %2981 = vmatprep.subr.bf16.mxu1 %v3626_v47 }
 0x461   :  { %v1184_v52 = vpop.f32.mrb[10].mxu0  ;;  %v1255_v22 = vpop.f32.mrb[10].mxu1 }
 0x462   :  { %v1186_v26 = vpop.f32.mrb[11].mxu0  ;;  %v1257_v28 = vpop.f32.mrb[11].mxu1 }
 0x463   :  { %v1264_v1 = vcombine.low %v1184_v52, %v1186_v26  ;;  %v1265_v2 = vcombine.low %v1255_v22, %v1257_v28 }
 0x465   :  { %v1272_v3 = vrot.slane %v1264_v1, %v3621_v31  ;;  %v1279_v5 = vrot.slane %v1265_v2, %v3621_v31 }
 0x467   :  { %v1280_v6 = vcombine.low %v1272_v3, %v1279_v5 }
 0x469   :  { %v1282_v35 = vadd.f32 %v1280_v6, %v4175_v9 }
 0x46b   :  { %v1283_v60 = vmul.f32 0.5, %v1282_v35  ;;  %v1288_v63 = vrot.slane %v1282_v35, 2  ;;  %v1294_v0 = vrot.slane %v1282_v35, 4  ;;  %v1297_v54 = vrot.slane %v1282_v35, 6 }
 0x46d   :  { %3262 = vtanh.f32 %v1283_v60  ;;  %v1290_v15 = vmul.f32 0.5, %v1288_v63  ;;  %v1299_v40 = vmul.f32 0.5, %v1297_v54 }
 0x46f   :  { %3264 = vtanh.f32 %v1290_v15 }
 0x470   :  { %3266 = vtanh.f32 %v1294_v0 }
 0x471   :  { %3268 = vtanh.f32 %v1299_v40 }
 0x477   :  { %v3263_v45 = vpop.eup %3262 }
 0x478   :  { %v1285_v16 = vmul.f32 0.5, %v3263_v45 }
 0x479   :  { %v3265_v19 = vpop.eup %3264 }
 0x47a   :  { %v1286_v52 = vadd.f32 0.5, %v1285_v16  ;;  %v1292_v22 = vmul.f32 0.5, %v3265_v19  ;;  %v3267_v28 = vpop.eup %3266  ;;  %v4176_v16 = vcombine.low %v3807_v11, %v3813_v42 }
 0x47b   :  { %v3269_v2 = vpop.eup %3268 }
 0x47c   :  { %v1293_v26 = vadd.f32 0.5, %v1292_v22  ;;  %v1304_v29 = vmul.f32 %v3267_v28, %v1286_v52  ;;  %v1301_v3 = vmul.f32 0.5, %v3269_v2 }
 0x47e   :  { %v1303_v27 = vmul.f32 %v1293_v26, %v3914_v41  ;;  %v1302_v5 = vadd.f32 0.5, %v1301_v3 }
 0x480   :  { %v3957_v1 = vadd.f32 %v1304_v29, %v1303_v27 }
 0x482   :  { %3270 = vtanh.f32 %v3957_v1 }
 0x48c   :  { %v3271_v6 = vpop.eup %3270 }
 0x48d   :  { %v1307_v9 = vmul.f32 %v3271_v6, %v1302_v5 }
 0x48f   :  { %1375 = vmatmul.mubr.f32.vlgmr.msra.gmra.mrb[12].mxu0 %v1307_v9  ;;  %1446 = vmatmul.mubr.f32.vlgmr.msra.gmra.mrb[12].mxu1 %v1307_v9 }
 0x490   :  { %2951 = vmatpush1.bf16.msra.mxu0 %v3631_v55  ;;  %2983 = vmatpush1.bf16.msra.mxu1 %v3633_v56 }
 0x491   :  { %2953 = vmatprep.subr.bf16.mxu0 %v3635_v61  ;;  %2985 = vmatprep.subr.bf16.mxu1 %v3637_v62 }
 0x492   :  { %1566 = vmatprep.mubr.f32.mxu0 %v4172_v4  ;;  %1637 = vmatprep.mubr.f32.mxu1 %v4172_v4 }
 0x494   :  { %2955 = vmatpush1.bf16.msra.mxu0 %v3643_v7  ;;  %2987 = vmatpush1.bf16.msra.mxu1 %v3645_v8 }
 0x495   :  { %2957 = vmatprep.subr.bf16.mxu0 %v3649_v12  ;;  %2989 = vmatprep.subr.bf16.mxu1 %v3651_v13 }
 0x498   :  { %2959 = vmatpush1.bf16.msra.mxu0 %v3657_v20  ;;  %2991 = vmatpush1.bf16.msra.mxu1 %v3659_v21 }
 0x499   :  { %2961 = vmatprep.subr.bf16.mxu0 %v3663_v24  ;;  %2993 = vmatprep.subr.bf16.mxu1 %v3665_v25 }
 0x49c   :  { %2963 = vmatpush1.bf16.msra.mxu0 %v3669_v33  ;;  %2995 = vmatpush1.bf16.msra.mxu1 %v3671_v34 }
 0x49d   :  { %2965 = vmatprep.subr.bf16.mxu0 %v3675_v37  ;;  %2997 = vmatprep.subr.bf16.mxu1 %v3677_v38 }
 0x4a0   :  { %2967 = vmatpush1.bf16.msra.mxu0 %v3681_v50  ;;  %2999 = vmatpush1.bf16.msra.mxu1 %v3683_v51 }
 0x4a1   :  { %2969 = vmatprep.subr.bf16.mxu0 %v3687_v58  ;;  %3001 = vmatprep.subr.bf16.mxu1 %v3689_v59 }
 0x4a4   :  { %2971 = vmatpush1.bf16.msra.mxu0 %v3695_v10  ;;  %3003 = vmatpush1.bf16.msra.mxu1 %v3697_v14 }
 0x4a5   :  { %2973 = vmatprep.subr.bf16.mxu0 %v3701_v17  ;;  %3005 = vmatprep.subr.bf16.mxu1 %v3703_v18 }
 0x4a8   :  { %2975 = vmatpush1.bf16.msra.mxu0 %v3709_v30  ;;  %3007 = vmatpush1.bf16.msra.mxu1 %v3711_v32 }
 0x4a9   :  { %2977 = vmatprep.subr.bf16.mxu0 %v3715_v36  ;;  %3009 = vmatprep.subr.bf16.mxu1 %v3717_v39 }
 0x4ac   :  { %2979 = vmatpush1.bf16.msra.mxu0 %v3723_v43  ;;  %3011 = vmatpush1.bf16.msra.mxu1 %v3725_v44 }
 0x4ad   :  { %3013 = vmatprep.subr.bf16.mxu0 %v3624_v46  ;;  %3045 = vmatprep.subr.bf16.mxu1 %v3626_v47 }
 0x562   :  { %v1376_v41 = vpop.f32.mrb[12].mxu0  ;;  %v1447_v35 = vpop.f32.mrb[12].mxu1 }
 0x563   :  { %v1378_v60 = vpop.f32.mrb[13].mxu0  ;;  %v1449_v63 = vpop.f32.mrb[13].mxu1 }
 0x564   :  { %v1456_v15 = vcombine.low %v1376_v41, %v1378_v60  ;;  %v1457_v0 = vcombine.low %v1447_v35, %v1449_v63 }
 0x566   :  { %v1464_v54 = vrot.slane %v1456_v15, %v3621_v31  ;;  %v1471_v40 = vrot.slane %v1457_v0, %v3621_v31 }
 0x568   :  { %v1472_v45 = vcombine.low %v1464_v54, %v1471_v40 }
 0x56a   :  { %v1474_v19 = vadd.f32 %v1472_v45, %v4176_v16 }
 0x56c   :  { %v1475_v52 = vmul.f32 0.5, %v1474_v19  ;;  %v1480_v22 = vrot.slane %v1474_v19, 2  ;;  %v1486_v28 = vrot.slane %v1474_v19, 4  ;;  %v1489_v27 = vrot.slane %v1474_v19, 6 }
 0x56e   :  { %3272 = vtanh.f32 %v1475_v52  ;;  %v1482_v26 = vmul.f32 0.5, %v1480_v22  ;;  %v1491_v29 = vmul.f32 0.5, %v1489_v27 }
 0x570   :  { %3274 = vtanh.f32 %v1482_v26 }
 0x571   :  { %3276 = vtanh.f32 %v1486_v28 }
 0x572   :  { %3278 = vtanh.f32 %v1491_v29 }
 0x578   :  { %v3273_v2 = vpop.eup %3272 }
 0x579   :  { %v1477_v3 = vmul.f32 0.5, %v3273_v2 }
 0x57a   :  { %v3275_v5 = vpop.eup %3274 }
 0x57b   :  { %v1478_v6 = vadd.f32 0.5, %v1477_v3  ;;  %v1484_v9 = vmul.f32 0.5, %v3275_v5  ;;  %v3277_v35 = vpop.eup %3276  ;;  %v4177_v3 = vcombine.high %v3807_v11, %v3813_v42 }
 0x57c   :  { %v3279_v0 = vpop.eup %3278 }
 0x57d   :  { %v1485_v41 = vadd.f32 0.5, %v1484_v9  ;;  %v1496_v63 = vmul.f32 %v3277_v35, %v1478_v6  ;;  %v1493_v54 = vmul.f32 0.5, %v3279_v0 }
 0x57f   :  { %v1495_v60 = vmul.f32 %v1485_v41, %v3957_v1  ;;  %v1494_v40 = vadd.f32 0.5, %v1493_v54 }
 0x581   :  { %v4000_v15 = vadd.f32 %v1496_v63, %v1495_v60 }
 0x583   :  { %3280 = vtanh.f32 %v4000_v15 }
 0x58d   :  { %v3281_v45 = vpop.eup %3280 }
 0x58e   :  { %v1499_v16 = vmul.f32 %v3281_v45, %v1494_v40 }
 0x590   :  { %1567 = vmatmul.mubr.f32.vlgmr.msra.gmra.mrb[14].mxu0 %v1499_v16  ;;  %1638 = vmatmul.mubr.f32.vlgmr.msra.gmra.mrb[14].mxu1 %v1499_v16 }
 0x591   :  { %3015 = vmatpush1.bf16.msra.mxu0 %v3631_v55  ;;  %3047 = vmatpush1.bf16.msra.mxu1 %v3633_v56 }
 0x592   :  { %3017 = vmatprep.subr.bf16.mxu0 %v3635_v61  ;;  %3049 = vmatprep.subr.bf16.mxu1 %v3637_v62 }
 0x593   :  { %1758 = vmatprep.mubr.f32.mxu0 %v4172_v4  ;;  %1829 = vmatprep.mubr.f32.mxu1 %v4172_v4 }
 0x595   :  { %3019 = vmatpush1.bf16.msra.mxu0 %v3643_v7  ;;  %3051 = vmatpush1.bf16.msra.mxu1 %v3645_v8 }
 0x596   :  { %3021 = vmatprep.subr.bf16.mxu0 %v3649_v12  ;;  %3053 = vmatprep.subr.bf16.mxu1 %v3651_v13 }
 0x599   :  { %3023 = vmatpush1.bf16.msra.mxu0 %v3657_v20  ;;  %3055 = vmatpush1.bf16.msra.mxu1 %v3659_v21 }
 0x59a   :  { %3025 = vmatprep.subr.bf16.mxu0 %v3663_v24  ;;  %3057 = vmatprep.subr.bf16.mxu1 %v3665_v25 }
 0x59d   :  { %3027 = vmatpush1.bf16.msra.mxu0 %v3669_v33  ;;  %3059 = vmatpush1.bf16.msra.mxu1 %v3671_v34 }
 0x59e   :  { %3029 = vmatprep.subr.bf16.mxu0 %v3675_v37  ;;  %3061 = vmatprep.subr.bf16.mxu1 %v3677_v38 }
 0x5a1   :  { %3031 = vmatpush1.bf16.msra.mxu0 %v3681_v50  ;;  %3063 = vmatpush1.bf16.msra.mxu1 %v3683_v51 }
 0x5a2   :  { %3033 = vmatprep.subr.bf16.mxu0 %v3687_v58  ;;  %3065 = vmatprep.subr.bf16.mxu1 %v3689_v59 }
 0x5a5   :  { %3035 = vmatpush1.bf16.msra.mxu0 %v3695_v10  ;;  %3067 = vmatpush1.bf16.msra.mxu1 %v3697_v14 }
 0x5a6   :  { %3037 = vmatprep.subr.bf16.mxu0 %v3701_v17  ;;  %3069 = vmatprep.subr.bf16.mxu1 %v3703_v18 }
 0x5a9   :  { %3039 = vmatpush1.bf16.msra.mxu0 %v3709_v30  ;;  %3071 = vmatpush1.bf16.msra.mxu1 %v3711_v32 }
 0x5aa   :  { %3041 = vmatprep.subr.bf16.mxu0 %v3715_v36  ;;  %3073 = vmatprep.subr.bf16.mxu1 %v3717_v39 }
 0x5ad   :  { %3043 = vmatpush1.bf16.msra.mxu0 %v3723_v43  ;;  %3075 = vmatpush1.bf16.msra.mxu1 %v3725_v44 }
 0x5ae   :  { %3077 = vmatprep.subr.bf16.mxu0 %v3624_v46  ;;  %3109 = vmatprep.subr.bf16.mxu1 %v3626_v47 }
 0x663   :  { %v1568_v1 = vpop.f32.mrb[14].mxu0  ;;  %v1639_v19 = vpop.f32.mrb[14].mxu1 }
 0x664   :  { %v1570_v52 = vpop.f32.mrb[15].mxu0  ;;  %v1641_v22 = vpop.f32.mrb[15].mxu1 }
 0x665   :  { %v1648_v26 = vcombine.low %v1568_v1, %v1570_v52  ;;  %v1649_v28 = vcombine.low %v1639_v19, %v1641_v22 }
 0x667   :  { %v1656_v27 = vrot.slane %v1648_v26, %v3621_v31  ;;  %v1663_v29 = vrot.slane %v1649_v28, %v3621_v31 }
 0x669   :  { %v1664_v2 = vcombine.low %v1656_v27, %v1663_v29  ;;  %v2082_v29 = vld [vmem:[#allocation14 + $0x8] sm:$0xff] }
 0x66b   :  { %v1666_v5 = vadd.f32 %v1664_v2, %v4177_v3  ;;  %v2086_v2 = vld [vmem:[#allocation14 + $0x28] sm:$0xff]  ;;  %v2084_v3 = vld [vmem:[#allocation14 + $0x18] sm:$0xff] }
 0x66d   :  { %v1667_v6 = vmul.f32 0.5, %v1666_v5  ;;  %v1672_v9 = vrot.slane %v1666_v5, 2  ;;  %v1678_v47 = vrot.slane %v1666_v5, 4  ;;  %v1681_v41 = vrot.slane %v1666_v5, 6 }
 0x66e   :  { %v3140_v5 = vpack.c.bf16 %v2086_v2, %v2082_v29  ;;  %v2115_v2 = vld [vmem:[#allocation14 + $0x110] sm:$0xff] }
 0x66f   :  { %3282 = vtanh.f32 %v1667_v6  ;;  %v1674_v46 = vmul.f32 0.5, %v1672_v9  ;;  %v1683_v35 = vmul.f32 0.5, %v1681_v41  ;;  %v2088_v6 = vld [vmem:[#allocation14 + $0x38] sm:$0xff]  ;;  %v2081_v9 = vld [vmem:[#allocation14] sm:$0xff] }
 0x671   :  { %3284 = vtanh.f32 %v1674_v46  ;;  %v2085_v46 = vld [vmem:[#allocation14 + $0x20] sm:$0xff] }
 0x672   :  { %3286 = vtanh.f32 %v1678_v47  ;;  %v3172_v47 = vpack.c.bf16 %v2088_v6, %v2084_v3  ;;  %v3142_v41 = vpack.c.bf16 %v2085_v46, %v2081_v9  ;;  %v2119_v3 = vld [vmem:[#allocation14 + $0x130] sm:$0xff]  ;;  %v2126_v9 = vld [vmem:[#allocation14 + $0x168] sm:$0xff]  ;;  %v2124_v46 = vld [vmem:[#allocation14 + $0x158] sm:$0xff] }
 0x673   :  { %3288 = vtanh.f32 %v1683_v35  ;;  %v2083_v35 = vld [vmem:[#allocation14 + $0x10] sm:$0xff]  ;;  %v3190_v6 = vpack.c.bf16 %v2119_v3, %v2115_v2  ;;  %v4179_v3 = vcombine.high %v3810_v23, %v3816_v57 }
 0x679   :  { %v3283_v60 = vpop.eup %3282 }
 0x67a   :  { %v1669_v63 = vmul.f32 0.5, %v3283_v60  ;;  %v2087_v60 = vld [vmem:[#allocation14 + $0x30] sm:$0xff] }
 0x67b   :  { %v3285_v0 = vpop.eup %3284 }
 0x67c   :  { %v1670_v54 = vadd.f32 0.5, %v1669_v63  ;;  %v1676_v40 = vmul.f32 0.5, %v3285_v0  ;;  %v3287_v16 = vpop.eup %3286  ;;  %v3174_v63 = vpack.c.bf16 %v2087_v60, %v2083_v35  ;;  %v2090_v0 = vld [vmem:[#allocation14 + $0x48] sm:$0xff]  ;;  %v2121_v60 = vld [vmem:[#allocation14 + $0x140] sm:$0xff] }
 0x67d   :  { %v3289_v19 = vpop.eup %3288 }
 0x67e   :  { %v1677_v45 = vadd.f32 0.5, %v1676_v40  ;;  %v1688_v11 = vmul.f32 %v3287_v16, %v1670_v54  ;;  %v1685_v52 = vmul.f32 0.5, %v3289_v19  ;;  %v2094_v54 = vld [vmem:[#allocation14 + $0x68] sm:$0xff]  ;;  %v2092_v40 = vld [vmem:[#allocation14 + $0x58] sm:$0xff] }
 0x67f   :  { %v2096_v16 = vld [vmem:[#allocation14 + $0x78] sm:$0xff] }
 0x680   :  { %v1687_v42 = vmul.f32 %v1677_v45, %v4000_v15  ;;  %v1686_v22 = vadd.f32 0.5, %v1685_v52  ;;  %v3144_v45 = vpack.c.bf16 %v2094_v54, %v2090_v0  ;;  %v2091_v52 = vld [vmem:[#allocation14 + $0x50] sm:$0xff] }
 0x681   :  { %v2123_v0 = vld [vmem:[#allocation14 + $0x150] sm:$0xff] }
 0x682   :  { %v4043_v1 = vadd.f32 %v1688_v11, %v1687_v42  ;;  %v2089_v42 = vld [vmem:[#allocation14 + $0x40] sm:$0xff] }
 0x683   :  { %v2093_v11 = vld [vmem:[#allocation14 + $0x60] sm:$0xff] }
 0x684   :  { %3290 = vtanh.f32 %v4043_v1  ;;  %v3146_v19 = vpack.c.bf16 %v2093_v11, %v2089_v42 }
 0x68e   :  { %v3291_v26 = vpop.eup %3290 }
 0x68f   :  { %v1691_v28 = vmul.f32 %v3291_v26, %v1686_v22  ;;  %v2095_v22 = vld [vmem:[#allocation14 + $0x70] sm:$0xff] }
 0x690   :  { %v3178_v26 = vpack.c.bf16 %v2095_v22, %v2091_v52  ;;  %v2129_v52 = vld [vmem:[#allocation14 + $0x180] sm:$0xff] }
 0x691   :  { %1759 = vmatmul.mubr.f32.vlgmr.msra.gmra.mrb[16].mxu0 %v1691_v28  ;;  %1830 = vmatmul.mubr.f32.vlgmr.msra.gmra.mrb[16].mxu1 %v1691_v28  ;;  %v2098_v28 = vld [vmem:[#allocation14 + $0x88] sm:$0xff] }
 0x692   :  { %3079 = vmatpush1.bf16.msra.mxu0 %v3631_v55  ;;  %3111 = vmatpush1.bf16.msra.mxu1 %v3633_v56 }
 0x693   :  { %3081 = vmatprep.subr.bf16.mxu0 %v3635_v61  ;;  %3113 = vmatprep.subr.bf16.mxu1 %v3637_v62 }
 0x694   :  { %1950 = vmatprep.mubr.f32.mxu0 %v4172_v4  ;;  %2021 = vmatprep.mubr.f32.mxu1 %v4172_v4 }
 0x696   :  { %3083 = vmatpush1.bf16.msra.mxu0 %v3643_v7  ;;  %3115 = vmatpush1.bf16.msra.mxu1 %v3645_v8 }
 0x697   :  { %3085 = vmatprep.subr.bf16.mxu0 %v3649_v12  ;;  %3117 = vmatprep.subr.bf16.mxu1 %v3651_v13 }
 0x69a   :  { %3087 = vmatpush1.bf16.msra.mxu0 %v3657_v20  ;;  %3119 = vmatpush1.bf16.msra.mxu1 %v3659_v21  ;;  %v4178_v21 = vcombine.low %v3810_v23, %v3816_v57 }
 0x69b   :  { %3089 = vmatprep.subr.bf16.mxu0 %v3663_v24  ;;  %3121 = vmatprep.subr.bf16.mxu1 %v3665_v25 }
 0x69e   :  { %3091 = vmatpush1.bf16.msra.mxu0 %v3669_v33  ;;  %3123 = vmatpush1.bf16.msra.mxu1 %v3671_v34 }
 0x69f   :  { %3093 = vmatprep.subr.bf16.mxu0 %v3675_v37  ;;  %3125 = vmatprep.subr.bf16.mxu1 %v3677_v38 }
 0x6a2   :  { %3095 = vmatpush1.bf16.msra.mxu0 %v3681_v50  ;;  %3127 = vmatpush1.bf16.msra.mxu1 %v3683_v51 }
 0x6a3   :  { %3097 = vmatprep.subr.bf16.mxu0 %v3687_v58  ;;  %3129 = vmatprep.subr.bf16.mxu1 %v3689_v59 }
 0x6a6   :  { %3099 = vmatpush1.bf16.msra.mxu0 %v3695_v10  ;;  %3131 = vmatpush1.bf16.msra.mxu1 %v3697_v14 }
 0x6a7   :  { %3101 = vmatprep.subr.bf16.mxu0 %v3701_v17  ;;  %3133 = vmatprep.subr.bf16.mxu1 %v3703_v18 }
 0x6aa   :  { %3103 = vmatpush1.bf16.msra.mxu0 %v3709_v30  ;;  %3135 = vmatpush1.bf16.msra.mxu1 %v3711_v32 }
 0x6ab   :  { %3105 = vmatprep.subr.bf16.mxu0 %v3715_v36  ;;  %3137 = vmatprep.subr.bf16.mxu1 %v3717_v39 }
 0x6ae   :  { %3107 = vmatpush1.bf16.msra.mxu0 %v3723_v43  ;;  %3139 = vmatpush1.bf16.msra.mxu1 %v3725_v44 }
 0x6af   :  { %3141 = vmatprep.subr.bf16.mxu0 %v3140_v5  ;;  %3173 = vmatprep.subr.bf16.mxu1 %v3172_v47  ;;  %v2122_v5 = vld [vmem:[#allocation14 + $0x148] sm:$0xff]  ;;  %v2128_v47 = vld [vmem:[#allocation14 + $0x178] sm:$0xff] }
 0x6b0   :  { %v3192_v35 = vpack.c.bf16 %v2128_v47, %v2124_v46 }
 0x764   :  { %v1760_v55 = vpop.f32.mrb[16].mxu0  ;;  %v1831_v56 = vpop.f32.mrb[16].mxu1 }
 0x765   :  { %v1762_v61 = vpop.f32.mrb[17].mxu0  ;;  %v1833_v62 = vpop.f32.mrb[17].mxu1 }
 0x766   :  { %v1840_v7 = vcombine.low %v1760_v55, %v1762_v61  ;;  %v1841_v8 = vcombine.low %v1831_v56, %v1833_v62  ;;  %v2102_v55 = vld [vmem:[#allocation14 + $0xa8] sm:$0xff]  ;;  %v2100_v56 = vld [vmem:[#allocation14 + $0x98] sm:$0xff] }
 0x767   :  { %v3148_v61 = vpack.c.bf16 %v2102_v55, %v2098_v28  ;;  %v2104_v62 = vld [vmem:[#allocation14 + $0xb8] sm:$0xff]  ;;  %v2131_v28 = vld [vmem:[#allocation14 + $0x190] sm:$0xff] }
 0x768   :  { %v1848_v12 = vrot.slane %v1840_v7, %v3621_v31  ;;  %v1855_v13 = vrot.slane %v1841_v8, %v3621_v31  ;;  %v2097_v7 = vld [vmem:[#allocation14 + $0x80] sm:$0xff]  ;;  %v2135_v55 = vld [vmem:[#allocation14 + $0x1b0] sm:$0xff] }
 0x769   :  { %v2101_v8 = vld [vmem:[#allocation14 + $0xa0] sm:$0xff] }
 0x76a   :  { %v1856_v20 = vcombine.low %v1848_v12, %v1855_v13  ;;  %v3180_v12 = vpack.c.bf16 %v2104_v62, %v2100_v56  ;;  %v3150_v13 = vpack.c.bf16 %v2101_v8, %v2097_v7  ;;  %v2142_v62 = vld [vmem:[#allocation14 + $0x1e8] sm:$0xff]  ;;  %v2140_v7 = vld [vmem:[#allocation14 + $0x1d8] sm:$0xff]  ;;  %v3198_v8 = vpack.c.bf16 %v2135_v55, %v2131_v28 }
 0x76b   :  { %v2323_v28 = vld [vmem:[#allocation16 + $0x68] sm:$0xff]  ;;  %v2321_v55 = vld [vmem:[#allocation16 + $0x58] sm:$0xff] }
 0x76c   :  { %v1858_v24 = vadd.f32 %v1856_v20, %v4178_v21  ;;  %v2099_v20 = vld [vmem:[#allocation14 + $0x90] sm:$0xff] }
 0x76d   :  { %v2103_v21 = vld [vmem:[#allocation14 + $0xb0] sm:$0xff] }
 0x76e   :  { %v1859_v25 = vmul.f32 0.5, %v1858_v24  ;;  %v1864_v33 = vrot.slane %v1858_v24, 2  ;;  %v1870_v37 = vrot.slane %v1858_v24, 4  ;;  %v1873_v38 = vrot.slane %v1858_v24, 6 }
 0x76f   :  { %v3182_v24 = vpack.c.bf16 %v2103_v21, %v2099_v20  ;;  %v2137_v20 = vld [vmem:[#allocation14 + $0x1c0] sm:$0xff] }
 0x770   :  { %3292 = vtanh.f32 %v1859_v25  ;;  %v1866_v34 = vmul.f32 0.5, %v1864_v33  ;;  %v1875_v50 = vmul.f32 0.5, %v1873_v38  ;;  %v2106_v25 = vld [vmem:[#allocation14 + $0xc8] sm:$0xff]  ;;  %v2112_v38 = vld [vmem:[#allocation14 + $0xf8] sm:$0xff]  ;;  %v2141_v21 = vld [vmem:[#allocation14 + $0x1e0] sm:$0xff] }
 0x771   :  { %v2110_v33 = vld [vmem:[#allocation14 + $0xe8] sm:$0xff] }
 0x772   :  { %3294 = vtanh.f32 %v1866_v34  ;;  %v2108_v34 = vld [vmem:[#allocation14 + $0xd8] sm:$0xff] }
 0x773   :  { %3296 = vtanh.f32 %v1870_v37  ;;  %v3152_v37 = vpack.c.bf16 %v2110_v33, %v2106_v25  ;;  %v2139_v25 = vld [vmem:[#allocation14 + $0x1d0] sm:$0xff] }
 0x774   :  { %3298 = vtanh.f32 %v1875_v50  ;;  %v2105_v50 = vld [vmem:[#allocation14 + $0xc0] sm:$0xff]  ;;  %v2143_v33 = vld [vmem:[#allocation14 + $0x1f0] sm:$0xff] }
 0x77a   :  { %v3293_v51 = vpop.eup %3292 }
 0x77b   :  { %v1861_v58 = vmul.f32 0.5, %v3293_v51  ;;  %v2109_v51 = vld [vmem:[#allocation14 + $0xe0] sm:$0xff] }
 0x77c   :  { %v3295_v59 = vpop.eup %3294 }
 0x77d   :  { %v1862_v10 = vadd.f32 0.5, %v1861_v58  ;;  %v1868_v14 = vmul.f32 0.5, %v3295_v59  ;;  %v3297_v18 = vpop.eup %3296  ;;  %v3184_v58 = vpack.c.bf16 %v2112_v38, %v2108_v34  ;;  %v3154_v59 = vpack.c.bf16 %v2109_v51, %v2105_v50  ;;  %v2311_v34 = vld [vmem:[#allocation16 + $0x8] sm:$0xff]  ;;  %v2313_v38 = vld [vmem:[#allocation16 + $0x18] sm:$0xff] }
 0x77e   :  { %v3299_v39 = vpop.eup %3298  ;;  %v2317_v50 = vld [vmem:[#allocation16 + $0x38] sm:$0xff]  ;;  %v3170_v51 = vpack.c.bf16 %v2141_v21, %v2137_v20  ;;  %v2322_v21 = vld [vmem:[#allocation16 + $0x60] sm:$0xff] }
 0x77f   :  { %v1869_v17 = vadd.f32 0.5, %v1868_v14  ;;  %v1880_v32 = vmul.f32 %v3297_v18, %v1862_v10  ;;  %v1877_v43 = vmul.f32 0.5, %v3299_v39  ;;  %v2107_v10 = vld [vmem:[#allocation14 + $0xd0] sm:$0xff]  ;;  %v2114_v18 = vld [vmem:[#allocation14 + $0x108] sm:$0xff] }
 0x780   :  { %v2111_v14 = vld [vmem:[#allocation14 + $0xf0] sm:$0xff] }
 0x781   :  { %v1879_v30 = vmul.f32 %v1869_v17, %v4043_v1  ;;  %v1878_v44 = vadd.f32 0.5, %v1877_v43  ;;  %v3176_v1 = vpack.c.bf16 %v2096_v16, %v2092_v40  ;;  %v3186_v17 = vpack.c.bf16 %v2111_v14, %v2107_v10  ;;  %v2120_v43 = vld [vmem:[#allocation14 + $0x138] sm:$0xff]  ;;  %v2127_v40 = vld [vmem:[#allocation14 + $0x170] sm:$0xff]  ;;  %v2134_v16 = vld [vmem:[#allocation14 + $0x1a8] sm:$0xff] }
 0x782   :  { %v3194_v42 = vpack.c.bf16 %v2127_v40, %v2123_v0  ;;  %v3212_v10 = vpack.c.bf16 %v2317_v50, %v2313_v38  ;;  %v4089_v14 = vld [vmem:[#allocation7] sm:$0x1]  ;;  %v2517_v38 = vld [vmem:[#allocation5] sm:$0x1]  ;;  %v2519_v50 = vld [vmem:[#allocation6] sm:$0x1] }
 0x783   :  { %v4084_v36 = vadd.f32 %v1880_v32, %v1879_v30  ;;  %v2118_v30 = vld [vmem:[#allocation14 + $0x128] sm:$0xff]  ;;  %v2116_v32 = vld [vmem:[#allocation14 + $0x118] sm:$0xff] }
 0x784   :  { %v3156_v39 = vpack.c.bf16 %v2118_v30, %v2114_v18  ;;  %v4092_v18 = vld [vmem:[#allocation8] sm:$0x1] }
 0x785   :  { %3300 = vtanh.f32 %v4084_v36 }
 0x78f   :  { %v3301_v15 = vpop.eup %3300 }
 0x790   :  { %v1883_v27 = vmul.f32 %v3301_v15, %v1878_v44  ;;  %v2113_v44 = vld [vmem:[#allocation14 + $0x100] sm:$0xff] }
 0x791   :  { %v2117_v15 = vld [vmem:[#allocation14 + $0x120] sm:$0xff] }
 0x792   :  { %1951 = vmatmul.mubr.f32.vlgmr.msra.gmra.mrb[18].mxu0 %v1883_v27  ;;  %2022 = vmatmul.mubr.f32.vlgmr.msra.gmra.mrb[18].mxu1 %v1883_v27  ;;  %v3188_v27 = vpack.c.bf16 %v2120_v43, %v2116_v32  ;;  %v3158_v29 = vpack.c.bf16 %v2117_v15, %v2113_v44 }
 0x793   :  { %2231 = vmatprep.mubr.f32.mxu0 %v4172_v4  ;;  %2302 = vmatprep.mubr.f32.mxu1 %v4172_v4 }
 0x794   :  { %3143 = vmatpush1.bf16.msra.mxu0 %v3142_v41  ;;  %3175 = vmatpush1.bf16.msra.mxu1 %v3174_v63  ;;  %v3160_v41 = vpack.c.bf16 %v2126_v9, %v2122_v5  ;;  %v2125_v63 = vld [vmem:[#allocation14 + $0x160] sm:$0xff] }
 0x795   :  { %3145 = vmatprep.subr.bf16.mxu0 %v3144_v45  ;;  %3177 = vmatprep.subr.bf16.mxu1 %v3176_v1  ;;  %v3162_v54 = vpack.c.bf16 %v2125_v63, %v2121_v60  ;;  %v2130_v45 = vld [vmem:[#allocation14 + $0x188] sm:$0xff]  ;;  %v2132_v1 = vld [vmem:[#allocation14 + $0x198] sm:$0xff] }
 0x796   :  { %v3164_v11 = vpack.c.bf16 %v2134_v16, %v2130_v45 }
 0x798   :  { %3147 = vmatpush1.bf16.msra.mxu0 %v3146_v19  ;;  %3179 = vmatpush1.bf16.msra.mxu1 %v3178_v26  ;;  %v2136_v19 = vld [vmem:[#allocation14 + $0x1b8] sm:$0xff]  ;;  %v2133_v26 = vld [vmem:[#allocation14 + $0x1a0] sm:$0xff] }
 0x799   :  { %3149 = vmatprep.subr.bf16.mxu0 %v3148_v61  ;;  %3181 = vmatprep.subr.bf16.mxu1 %v3180_v12  ;;  %v3196_v22 = vpack.c.bf16 %v2136_v19, %v2132_v1  ;;  %v3166_v56 = vpack.c.bf16 %v2133_v26, %v2129_v52  ;;  %v2138_v61 = vld [vmem:[#allocation14 + $0x1c8] sm:$0xff]  ;;  %v2310_v1 = vld [vmem:[#allocation16] sm:$0xff]  ;;  %v2312_v52 = vld [vmem:[#allocation16 + $0x10] sm:$0xff] }
 0x79a   :  { %v3168_v12 = vpack.c.bf16 %v2142_v62, %v2138_v61  ;;  %v2314_v19 = vld [vmem:[#allocation16 + $0x20] sm:$0xff]  ;;  %v2319_v26 = vld [vmem:[#allocation16 + $0x48] sm:$0xff] }
 0x79c   :  { %3151 = vmatpush1.bf16.msra.mxu0 %v3150_v13  ;;  %3183 = vmatpush1.bf16.msra.mxu1 %v3182_v24  ;;  %v2144_v13 = vld [vmem:[#allocation14 + $0x1f8] sm:$0xff] }
 0x79d   :  { %3153 = vmatprep.subr.bf16.mxu0 %v3152_v37  ;;  %3185 = vmatprep.subr.bf16.mxu1 %v3184_v58  ;;  %v3200_v24 = vpack.c.bf16 %v2144_v13, %v2140_v7  ;;  %v2315_v37 = vld [vmem:[#allocation16 + $0x28] sm:$0xff]  ;;  %v3202_v58 = vpack.c.bf16 %v2143_v33, %v2139_v25  ;;  %v3206_v7 = vpack.c.bf16 %v2314_v19, %v2310_v1  ;;  %v2324_v25 = vld [vmem:[#allocation16 + $0x70] sm:$0xff] }
 0x79e   :  { %v3208_v13 = vpack.c.bf16 %v2323_v28, %v2319_v26 }
 0x7a0   :  { %3155 = vmatpush1.bf16.msra.mxu0 %v3154_v59  ;;  %3187 = vmatpush1.bf16.msra.mxu1 %v3186_v17  ;;  %v3204_v59 = vpack.c.bf16 %v2315_v37, %v2311_v34  ;;  %v3440_v17 = vmov 0   ;;  %v2309_v37 = vld [vmem:[%s4152_s1] sm:$0x3] }
 0x7a1   :  { %3157 = vmatprep.subr.bf16.mxu0 %v3156_v39  ;;  %3189 = vmatprep.subr.bf16.mxu1 %v3188_v27 }
 0x7a2   :  { %3231 = vset.pattern.permute.xlu0 %v3440_v17 }
 0x7a3   :  { %2497 = vperm.xlu0 %3231, %v4089_v14  }
 0x7a4   :  { %3159 = vmatpush1.bf16.msra.mxu0 %v3158_v29  ;;  %3191 = vmatpush1.bf16.msra.mxu1 %v3190_v6 }
 0x7a5   :  { %3161 = vmatprep.subr.bf16.mxu0 %v3160_v41  ;;  %3193 = vmatprep.subr.bf16.mxu1 %v3192_v35 }
 0x7a7   :  { %2509 = vperm.xlu0 %3231, %v4092_v18  }
 0x7a8   :  { %3163 = vmatpush1.bf16.msra.mxu0 %v3162_v54  ;;  %3195 = vmatpush1.bf16.msra.mxu1 %v3194_v42 }
 0x7a9   :  { %3165 = vmatprep.subr.bf16.mxu0 %v3164_v11  ;;  %3197 = vmatprep.subr.bf16.mxu1 %v3196_v22  ;;  %v2316_v22 = vld [vmem:[#allocation16 + $0x30] sm:$0xff] }
 0x7ac   :  { %3167 = vmatpush1.bf16.msra.mxu0 %v3166_v56  ;;  %3199 = vmatpush1.bf16.msra.mxu1 %v3198_v8  ;;  %v2325_v56 = vld [vmem:[#allocation16 + $0x78] sm:$0xff]  ;;  %v3214_v8 = vpack.c.bf16 %v2316_v22, %v2312_v52 }
 0x7ad   :  { %3169 = vmatprep.subr.bf16.mxu0 %v3168_v12  ;;  %3201 = vmatprep.subr.bf16.mxu1 %v3200_v24  ;;  %v2318_v12 = vld [vmem:[#allocation16 + $0x40] sm:$0xff]  ;;  %v3216_v20 = vpack.c.bf16 %v2325_v56, %v2321_v55  ;;  %v2320_v24 = vld [vmem:[#allocation16 + $0x50] sm:$0xff] }
 0x7ae   :  { %v3210_v33 = vpack.c.bf16 %v2322_v21, %v2318_v12  ;;  %v3218_v34 = vpack.c.bf16 %v2324_v25, %v2320_v24 }
 0x7b0   :  { %3171 = vmatpush1.bf16.msra.mxu0 %v3170_v51  ;;  %3203 = vmatpush1.bf16.msra.mxu1 %v3202_v58  ;;  %v2518_v51 = vmul.f32 %v2517_v38, %v4089_v14  ;;  %v2520_v58 = vmul.f32 %v2519_v50, %v4092_v18  ;;  %v2506_v18 = vld [vmem:[%s4162_s11] sm:$0xf] }
 0x7b1   :  { %3205 = vmatprep.subr.bf16.mxu0 %v3204_v59  ;;  %3213 = vmatprep.subr.bf16.mxu1 %v3212_v10 }
 0x7b2   :  { %v4110_v59 = vadd.f32 %v2520_v58, %v2518_v51 }
 0x822   :  { %v2498_v10 = vpop.permute.xlu0 %2497 }
 0x823   :  { %v2503_v17 = vrot.slane %v2498_v10, %v3768_v48  ;;  %v2590_v10 = vrot.slane %v4110_v59, %v3768_v48 }
 0x865   :  { %v1952_v30 = vpop.f32.mrb[18].mxu0  ;;  %v2023_v32 = vpop.f32.mrb[18].mxu1 }
 0x866   :  { %v1954_v39 = vpop.f32.mrb[19].mxu0  ;;  %v2025_v43 = vpop.f32.mrb[19].mxu1 }
 0x867   :  { %v2032_v44 = vcombine.low %v1952_v30, %v1954_v39  ;;  %v2033_v15 = vcombine.low %v2023_v32, %v2025_v43  ;;  %v2494_v30 = vld [vmem:[%s4160_s9] sm:$0xf] }
 0x868   :  { %v2145_v39 = vld [vmem:[%s4157_s6] sm:$0xf] }
 0x869   :  { %v2040_v27 = vrot.slane %v2032_v44, %v3621_v31  ;;  %v2047_v29 = vrot.slane %v2033_v15, %v3621_v31 }
 0x86b   :  { %v2048_v2 = vcombine.low %v2040_v27, %v2047_v29  ;;  %v2504_v27 = vmul.f32 %v2503_v17, %v2494_v30  ;;  %v2326_v29 = vld [vmem:[%s4159_s8] sm:$0xf] }
 0x86d   :  { %v2050_v5 = vadd.f32 %v2048_v2, %v4179_v3  ;;  %v2150_v2 = vrot.slane %v2145_v39, %v3768_v48  ;;  %v2158_v3 = vrot.slane %v2145_v39, %v3771_v49 }
 0x86f   :  { %v2051_v6 = vmul.f32 0.5, %v2050_v5  ;;  %v2056_v9 = vrot.slane %v2050_v5, 2  ;;  %v2062_v47 = vrot.slane %v2050_v5, 4  ;;  %v2065_v41 = vrot.slane %v2050_v5, 6 }
 0x871   :  { %3302 = vtanh.f32 %v2051_v6  ;;  %v2058_v46 = vmul.f32 0.5, %v2056_v9  ;;  %v2067_v35 = vmul.f32 0.5, %v2065_v41  ;;  %v2154_v6 = vrot.slane %v2145_v39, %v3777_v53  ;;  %v4180_v9 = vld [vmem:[#allocation20_spill] sm:$0xff] }
 0x872   :  { %v2339_v41 = vrot.slane %v2326_v29, %v3771_v49 }
 0x873   :  { %3304 = vtanh.f32 %v2058_v46  ;;  %v2162_v46 = vrot.slane %v2145_v39, %v4180_v9 }
 0x874   :  { %3306 = vtanh.f32 %v2062_v47  ;;  %v2331_v47 = vrot.slane %v2326_v29, %v3768_v48 }
 0x875   :  { %3308 = vtanh.f32 %v2067_v35  ;;  %v2526_v35 = vrot.slane %v2504_v27, %v3768_v48 }
 0x87b   :  { %v3303_v60 = vpop.eup %3302 }
 0x87c   :  { %v2053_v63 = vmul.f32 0.5, %v3303_v60  ;;  %v2335_v60 = vrot.slane %v2326_v29, %v3777_v53 }
 0x87d   :  { %v3305_v0 = vpop.eup %3304 }
 0x87e   :  { %v2054_v54 = vadd.f32 0.5, %v2053_v63  ;;  %v2060_v40 = vmul.f32 0.5, %v3305_v0  ;;  %v3307_v45 = vpop.eup %3306  ;;  %v2343_v63 = vrot.slane %v2326_v29, %v4180_v9 }
 0x87f   :  { %v3309_v42 = vpop.eup %3308 }
 0x880   :  { %v2061_v31 = vadd.f32 0.5, %v2060_v40  ;;  %v2072_v57 = vmul.f32 %v3307_v45, %v2054_v54  ;;  %v2069_v11 = vmul.f32 0.5, %v3309_v42  ;;  %v2534_v40 = vrot.slane %v2504_v27, %v3771_v49 }
 0x882   :  { %v2071_v23 = vmul.f32 %v2061_v31, %v4084_v36  ;;  %v2070_v61 = vadd.f32 0.5, %v2069_v11  ;;  %v2530_v31 = vrot.slane %v2504_v27, %v3777_v53 }
 0x884   :  { %v2073_v16 = vadd.f32 %v2072_v57, %v2071_v23  ;;  %v2538_v57 = vrot.slane %v2504_v27, %v4180_v9 }
 0x886   :  { %3310 = vtanh.f32 %v2073_v16  ;;  %2077 = vst [vmem:[#allocation4] sm:$0x3] %v2073_v16 }
 0x890   :  { %v3311_v62 = vpop.eup %3310 }
 0x891   :  { %v2075_v36 = vmul.f32 %v3311_v62, %v2070_v61 }
 0x893   :  { %2076 = vst [vmem:[#allocation3] sm:$0x3] %v2075_v36  ;;  %2232 = vmatmul.mubr.f32.vlgmr.msra.gmra.mrb[20].mxu0 %v2075_v36  ;;  %2303 = vmatmul.mubr.f32.vlgmr.msra.gmra.mrb[20].mxu1 %v2075_v36 }
 0x894   :  { %3207 = vmatpush1.bf16.msra.mxu0 %v3206_v7  ;;  %3215 = vmatpush1.bf16.msra.mxu1 %v3214_v8 }
 0x895   :  { %3209 = vmatprep.subr.bf16.mxu0 %v3208_v13  ;;  %3217 = vmatprep.subr.bf16.mxu1 %v3216_v20 }
 0x896   :  { %2415 = vmatprep.mubr.f32.mxu0 %v4172_v4  ;;  %2486 = vmatprep.mubr.f32.mxu1 %v4172_v4  ;;  %v2510_v4 = vpop.permute.xlu0 %2509 }
 0x897   :  { %v2515_v32 = vrot.slane %v2510_v4, %v3768_v48 }
 0x898   :  { %3211 = vmatpush1.bf16.msra.mxu0 %v3210_v33  ;;  %3219 = vmatpush1.bf16.msra.mxu1 %v3218_v34 }
 0x899   :  { %v2516_v5 = vmul.f32 %v2515_v32, %v2506_v18 }
 0x89b   :  { %2610 = vmatmul.mubr.msk.f32.vlgmr.msra.gmra.mrb[22].mxu0 %vm220_vm0, %v2309_v37  ;;  %2611 = vmatmul.mubr.msk.f32.vlgmr.msra.gmra.mrb[22].mxu1 %vm220_vm0, %v2309_v37  ;;  %v2551_v42 = vrot.slane %v2516_v5, %v3768_v48  ;;  %v2559_v52 = vrot.slane %v2516_v5, %v3771_v49  ;;  %v2555_v26 = vrot.slane %v2516_v5, %v3777_v53 }
 0x89c   :  { %v2563_v61 = vrot.slane %v2516_v5, %v4180_v9 }
 0x966   :  { %v2233_v43 = vpop.f32.mrb[20].mxu0  ;;  %v2304_v14 = vpop.f32.mrb[20].mxu1 }
 0x967   :  { %v2235_v44 = vpop.f32.mrb[21].mxu0  ;;  %v2306_v15 = vpop.f32.mrb[21].mxu1  ;;  %v2234_v0 = vadd.f32 %v2233_v43, %v2150_v2  ;;  %v2305_v54 = vadd.f32 %v2304_v14, %v2158_v3 }
 0x968   :  { %v2236_v45 = vadd.f32 %v2235_v44, %v2154_v6  ;;  %v2307_v23 = vadd.f32 %v2306_v15, %v2162_v46 }
 0x969   :  { %v2543_v62 = vmul.f32 %v2526_v35, %v2234_v0  ;;  %v2545_v7 = vmul.f32 %v2534_v40, %v2305_v54 }
 0x96a   :  { %v2544_v36 = vmul.f32 %v2530_v31, %v2236_v45  ;;  %v2546_v13 = vmul.f32 %v2538_v57, %v2307_v23 }
 0x96e   :  { %v2417_v16 = vpop.f32.mrb[22].mxu0  ;;  %v2488_v11 = vpop.f32.mrb[22].mxu1 }
 0x96f   :  { %v2418_v1 = vadd.f32 %v2417_v16, %v2331_v47  ;;  %v2489_v19 = vadd.f32 %v2488_v11, %v2339_v41  ;;  %v2419_v22 = vpop.f32.mrb[23].mxu0  ;;  %v2490_v28 = vpop.f32.mrb[23].mxu1 }
 0x970   :  { %v2420_v55 = vadd.f32 %v2419_v22, %v2335_v60  ;;  %v2491_v56 = vadd.f32 %v2490_v28, %v2343_v63 }
 0x971   :  { %v2568_v8 = vmul.f32 %v2551_v42, %v2418_v1  ;;  %v2570_v12 = vmul.f32 %v2559_v52, %v2489_v19 }
 0x972   :  { %v2569_v20 = vmul.f32 %v2555_v26, %v2420_v55  ;;  %v2571_v21 = vmul.f32 %v2563_v61, %v2491_v56 }
 0x973   :  { %v2572_v24 = vadd.f32 %v2568_v8, %v2543_v62  ;;  %v2574_v25 = vadd.f32 %v2570_v12, %v2545_v7 }
 0x974   :  { %v2573_v49 = vadd.f32 %v2569_v20, %v2544_v36  ;;  %v2575_v33 = vadd.f32 %v2571_v21, %v2546_v13 }
 0x975   :  { %v2577_v53 = vsel %vm2576_vm1, %v2572_v24, 0.0  ;;  %v2580_v38 = vsel %vm2576_vm1, %v2574_v25, 0.0 }
 0x976   :  { %v2578_v34 = vsel %vm2576_vm1, %v2573_v49, 0.0  ;;  %v2582_v51 = vsel %vm2576_vm1, %v2575_v33, 0.0 }
 0x977   :  { %v2579_v37 = vadd.f32 %v2578_v34, %v2577_v53 }
 0x979   :  { %v2581_v50 = vadd.f32 %v2580_v38, %v2579_v37 }
 0x97b   :  { %v2583_v58 = vadd.f32 %v2582_v51, %v2581_v50 }
 0x97d   :  { %2584 = vadd.xlane.f32.xlu1 %v2583_v58 }
 0xa0a   :  { %v2585_v4 = vpop.xlane.xlu1 %2584 }
 0xa0b   :  { %v2592_v17 = vadd.f32 %v2590_v10, %v2585_v4 }
 0xa0d   :  { %v2593_v30 = vmul.f32 0.5, %v2592_v17 }
 0xa0f   :  { %3312 = vtanh.f32 %v2593_v30 }
 0xa19   :  { %v3313_v32 = vpop.eup %3312 }
 0xa1a   :  { %v2595_v39 = vmul.f32 0.5, %v3313_v32 }
 0xa1c   :  { %v2596_v43 = vadd.f32 0.5, %v2595_v39 }
 0xa1e   :  { %2598 = vst.msk [vmem:[%s4163_s15] sm:$0x3] %vm2597_vm2, %v2596_v43 }
 0xa1f   :  { %2603 = vsyncpa [#allocation10], 1 }
 0xa20   :  { %2604 = vsyncpa [#allocation12], 1 }
 0xa21   :  { %2605 = vsyncpa [#allocation15], 1 }

</bundles_post_ra>
